<compile_context>
chip_gen: v7x
topology: tpu7x:2x2x1
jax: 0.10.0
libtpu: 0.0.40
codegen_flags: <defaults>
</compile_context>

<pallas_src>
import math

import jax
import jax.numpy as jnp
from jax import lax
from jax.experimental import pallas as pl
from jax.experimental.pallas import tpu as pltpu


# ----------------------------------------------------------------------------
# Small matrix builders (JAX mirrors of the torch helpers) -- glue only.
# ----------------------------------------------------------------------------
def _r_2d(t):
    a = jnp.ones_like(t)
    b = jnp.zeros_like(t)
    c = jnp.cos(t)
    s = jnp.sin(t)
    return jnp.stack([jnp.stack([c, -s, b], -1),
                      jnp.stack([s, c, b], -1),
                      jnp.stack([b, b, a], -1)], -2)


def _r_3d(t, v):
    x, y, z = v[0], v[1], v[2]
    xx, yy, zz = x * x, y * y, z * z
    xy, xz, yz = x * y, x * z, y * z
    a = jnp.ones_like(t)
    b = jnp.zeros_like(t)
    c = jnp.cos(t)
    d = 1.0 - c
    s = jnp.sin(t)
    # NOTE: sign pattern copied verbatim from the PyTorch reference (the
    # reference uses `xz*d - y*s` for BOTH the [0,2] and [2,0] entries).
    return jnp.stack([
        jnp.stack([c + xx * d, xy * d - z * s, xz * d - y * s, b], -1),
        jnp.stack([xy * d + z * s, c + yy * d, yz * d - x * s, b], -1),
        jnp.stack([xz * d - y * s, yz * d + x * s, c + zz * d, b], -1),
        jnp.stack([b, b, b, a], -1)], -2)


def _s_2d(x, y):
    a = jnp.ones_like(x)
    b = jnp.zeros_like(x)
    return jnp.stack([jnp.stack([x, b, b], -1),
                      jnp.stack([b, y, b], -1),
                      jnp.stack([b, b, a], -1)], -2)


def _s_3d(x, y, z):
    a = jnp.ones_like(x)
    b = jnp.zeros_like(x)
    return jnp.stack([jnp.stack([x, b, b, b], -1),
                      jnp.stack([b, y, b, b], -1),
                      jnp.stack([b, b, z, b], -1),
                      jnp.stack([b, b, b, a], -1)], -2)


def _t_2d(x, y):
    a = jnp.ones_like(x)
    b = jnp.zeros_like(x)
    return jnp.stack([jnp.stack([a, b, x], -1),
                      jnp.stack([b, a, y], -1),
                      jnp.stack([b, b, a], -1)], -2)


def _t_3d(x, y, z):
    a = jnp.ones_like(x)
    b = jnp.zeros_like(x)
    return jnp.stack([jnp.stack([a, b, b, x], -1),
                      jnp.stack([b, a, b, y], -1),
                      jnp.stack([b, b, a, z], -1),
                      jnp.stack([b, b, b, a], -1)], -2)


# ----------------------------------------------------------------------------
# Sampling (theta / phi), matching the torch module's semantics.
# ----------------------------------------------------------------------------
B_STD, C_STD, H_MAX, S_STD = 0.2, 0.5, 1.0, 1.0
_V = jnp.array([1.0, 1.0, 1.0, 0.0]) / math.sqrt(3.0)
_VV = jnp.outer(_V, _V)


def sample_theta(key, n, p):
    ks = jax.random.split(key, 7)
    theta = jnp.eye(3, dtype=jnp.float32)[None]
    # image flip
    m = jax.random.uniform(ks[0], (n,)) < p
    x = 1.0 - 2.0 * jnp.where(m, jax.random.randint(ks[1], (n,), 0, 2).astype(jnp.float32), 0.0)
    theta = theta @ _s_2d(x, jnp.ones_like(x))
    # rotate (multiples of 90 deg)
    m = jax.random.uniform(ks[2], (n,)) < p
    t = 0.5 * math.pi * jnp.where(m, jax.random.randint(ks[3], (n,), 0, 4).astype(jnp.float32), 0.0)
    theta = theta @ _r_2d(t)
    # translate
    m = jax.random.uniform(ks[4], (n,)) < p
    tx = jnp.where(m, jax.random.uniform(ks[5], (n,)) * 2.0 - 1.0, 0.0)
    ty = jnp.where(m, jax.random.uniform(ks[6], (n,)) * 2.0 - 1.0, 0.0)
    theta = theta @ _t_2d(tx, ty)
    return theta.astype(jnp.float32)


def sample_phi(key, n, p):
    ks = jax.random.split(key, 10)
    id4 = jnp.eye(4, dtype=jnp.float32)[None]
    phi = id4
    # brightness
    m = jax.random.uniform(ks[0], (n,)) < p
    b = jnp.where(m, jax.random.normal(ks[1], (n,)) * B_STD, 0.0)
    phi = phi @ _t_3d(b, b, b)
    # contrast
    m = jax.random.uniform(ks[2], (n,)) < p
    q = jnp.where(m, jnp.exp2(jax.random.normal(ks[3], (n,)) * C_STD), 1.0)
    phi = phi @ _s_3d(q, q, q)
    # luma flip
    m = jax.random.uniform(ks[4], (n,)) < p
    i = jnp.where(m, jax.random.randint(ks[5], (n,), 0, 2).astype(jnp.float32), 0.0)
    phi = phi @ (id4 - 2.0 * _VV * i[:, None, None])
    # hue
    m = jax.random.uniform(ks[6], (n,)) < p
    t = jnp.where(m, (jax.random.uniform(ks[7], (n,)) * 2.0 - 1.0) * math.pi * H_MAX, 0.0)
    phi = phi @ _r_3d(t, _V)
    # saturation
    m = jax.random.uniform(ks[8], (n,)) < p
    s = jnp.where(m, jnp.exp2(jax.random.normal(ks[9], (n,)) * S_STD), 1.0)
    phi = phi @ (_VV + (id4 - _VV) * s[:, None, None])
    return phi.astype(jnp.float32)


# ----------------------------------------------------------------------------
# Pallas kernel: separable nearest-neighbour warp + per-image color transform.
# ----------------------------------------------------------------------------
def _make_kernel(NB, C, H, W):
    HW = H * W
    w_pow2 = (W & (W - 1)) == 0
    lg_w = W.bit_length() - 1

    def kernel(flags_ref, theta_ref, phi_ref, xrows_ref, xdense_ref, o_ref):
        g = pl.program_id(0)
        apply_theta = flags_ref[0] != 0
        apply_phi = flags_ref[1] != 0

        # ---------------- geometric warp (batch-global gate) ----------------
        @pl.when(apply_theta)
        def _():
            # destination-pixel coordinates (shared by all NB images)
            lane = lax.broadcasted_iota(jnp.int32, (1, HW), 1)
            if w_pow2:
                jj = lane & (W - 1)
                ii = lane >> lg_w
            else:
                jj = lane % W
                ii = lane // W
            xj = jj.astype(jnp.float32) * (2.0 / (W - 1)) - 1.0   # (1, HW)
            yi = ii.astype(jnp.float32) * (2.0 / (H - 1)) - 1.0   # (1, HW)
            hsrc = lax.broadcasted_iota(jnp.int32, (H, HW), 0).astype(jnp.float32)
            wsrc = lax.broadcasted_iota(jnp.int32, (W, HW), 0).astype(jnp.float32)

            for nb in range(NB):
                tb = (g * NB + nb) * 6
                t00 = theta_ref[tb + 0]
                t01 = theta_ref[tb + 1]
                t02 = theta_ref[tb + 2]
                t10 = theta_ref[tb + 3]
                t11 = theta_ref[tb + 4]
                t12 = theta_ref[tb + 5]

                gx = t00 * xj + t01 * yi + t02
                gy = t10 * xj + t11 * yi + t12
                # (grid + 1) % 2 - 1  (wrap into [-1, 1))
                gx = jnp.mod(gx + 1.0, 2.0) - 1.0
                gy = jnp.mod(gy + 1.0, 2.0) - 1.0
                # un-normalize (align_corners=True) + nearest (ties-to-even)
                ixf = jnp.round((gx + 1.0) * 0.5 * (W - 1))       # exact ints
                iyf = jnp.round((gy + 1.0) * 0.5 * (H - 1))

                pcol = (wsrc == ixf).astype(jnp.float32)          # (W, HW)
                prow = (hsrc == iyf).astype(jnp.float32)          # (H, HW)

                x_img = xrows_ref[nb]                             # (C*H, W)
                # column gather on the MXU
                tmp = jnp.dot(x_img, pcol,
                              preferred_element_type=jnp.float32)  # (C*H, HW)
                # row gather as masked sublane reduce
                rows = []
                for c in range(C):
                    seg = tmp[c * H:(c + 1) * H, :] * prow
                    rows.append(jnp.sum(seg, axis=0, keepdims=True))
                o_ref[nb] = jnp.concatenate(rows, axis=0)         # (C, HW)

        @pl.when(flags_ref[0] == 0)
        def _():
            o_ref[...] = xdense_ref[...]

        # ---------------- color transform (batch-global gate) ---------------
        @pl.when(apply_phi)
        def _():
            for nb in range(NB):
                pb = (g * NB + nb) * 12
                a00 = phi_ref[pb + 0]
                a01 = phi_ref[pb + 1]
                a02 = phi_ref[pb + 2]
                b0 = phi_ref[pb + 3]
                a10 = phi_ref[pb + 4]
                a11 = phi_ref[pb + 5]
                a12 = phi_ref[pb + 6]
                b1 = phi_ref[pb + 7]
                a20 = phi_ref[pb + 8]
                a21 = phi_ref[pb + 9]
                a22 = phi_ref[pb + 10]
                b2 = phi_ref[pb + 11]

                xs = o_ref[nb]                    # (C, HW)
                xm = xs * 2.0 - 1.0
                xr = xm[0:1, :]
                xg = xm[1:2, :]
                xb = xm[2:3, :]
                yr = a00 * xr + a01 * xg + a02 * xb + b0
                yg = a10 * xr + a11 * xg + a12 * xb + b1
                yb = a20 * xr + a21 * xg + a22 * xb + b2
                col = jnp.concatenate([yr, yg, yb], axis=0)
                o_ref[nb] = (col + 1.0) * 0.5

    return kernel


def augmentations_apply(x, theta, phi):
    """x: (N, 3, H, W) float32; theta: (N,3,3); phi: (N,4,4)."""
    N, C, H, W = x.shape
    assert C == 3, "color transform requires 3 channels"
    HW = H * W
    NB = min(8, N)
    G = pl.cdiv(N, NB)
    N_pad = G * NB

    x = x.astype(jnp.float32)
    theta = theta.astype(jnp.float32)
    phi = phi.astype(jnp.float32)

    id3 = jnp.eye(3, dtype=jnp.float32)
    id4 = jnp.eye(4, dtype=jnp.float32)
    flags = jnp.stack([jnp.any(theta != id3[None]),
                       jnp.any(phi != id4[None])]).astype(jnp.int32)

    if N_pad != N:
        pad = N_pad - N
        x = jnp.concatenate([x, jnp.zeros((pad, C, H, W), jnp.float32)], axis=0)
        theta = jnp.concatenate(
            [theta, jnp.broadcast_to(id3[None], (pad, 3, 3))], axis=0)
        phi = jnp.concatenate(
            [phi, jnp.broadcast_to(id4[None], (pad, 4, 4))], axis=0)

    # Two (free, metadata-only) views of the same image data:
    #   x_rows  (N, C*H, W)  -> operand of the column-gather matmul
    #   x_dense (N, C, H*W)  -> lane-dense pass-through for the bypass path
    x_rows = x.reshape(N_pad, C * H, W)
    x_dense = x.reshape(N_pad, C, HW)
    theta_flat = theta[:, :2, :].reshape(N_pad * 6)     # 1-D SMEM (no padding blowup)
    phi_flat = phi[:, :3, :].reshape(N_pad * 12)        # 1-D SMEM

    out = pl.pallas_call(
        _make_kernel(NB, C, H, W),
        out_shape=jax.ShapeDtypeStruct((N_pad, C, HW), jnp.float32),
        grid_spec=pl.GridSpec(
            grid=(G,),
            in_specs=[
                pl.BlockSpec(memory_space=pltpu.MemorySpace.SMEM),   # flags (2,)
                pl.BlockSpec(memory_space=pltpu.MemorySpace.SMEM),   # theta (N*6,)
                pl.BlockSpec(memory_space=pltpu.MemorySpace.SMEM),   # phi   (N*12,)
                pl.BlockSpec((NB, C * H, W), lambda g: (g, 0, 0)),   # x rows view
                pl.BlockSpec((NB, C, HW), lambda g: (g, 0, 0)),      # x dense view
            ],
            out_specs=pl.BlockSpec((NB, C, HW), lambda g: (g, 0, 0)),
        ),
        compiler_params=pltpu.CompilerParams(
            dimension_semantics=("parallel",),
            vmem_limit_bytes=32 * 1024 * 1024,
        ),
    )(flags, theta_flat, phi_flat, x_rows, x_dense)
    # TODO(synk): for very large H*W, add a grid axis over destination-pixel
    # tiles so Prow/Pcol/tmp are built per tile.
    return out[:N].reshape(N, C, H, W)


@jax.jit
def augmentations_forward(x, key, p):
    n = x.shape[0]
    k_theta, k_phi = jax.random.split(key)
    theta = sample_theta(k_theta, n, p)
    phi = sample_phi(k_phi, n, p)
    return augmentations_apply(x, theta, phi)


# ----------------------------------------------------------------------------
# Pure-JAX reference of the same forward math (for checking only).
# ----------------------------------------------------------------------------
def _reference_apply(x, theta, phi):
    N, C, H, W = x.shape
    id3 = jnp.eye(3, dtype=jnp.float32)[None]
    id4 = jnp.eye(4, dtype=jnp.float32)[None]

    def warp(inp):
        jj = jnp.arange(W, dtype=jnp.float32) * (2.0 / (W - 1)) - 1.0
        ii = jnp.arange(H, dtype=jnp.float32) * (2.0 / (H - 1)) - 1.0
        XJ = jnp.broadcast_to(jj[None, :], (H, W))
        YI = jnp.broadcast_to(ii[:, None], (H, W))
        gx = (theta[:, None, None, 0, 0] * XJ + theta[:, None, None, 0, 1] * YI
              + theta[:, None, None, 0, 2])
        gy = (theta[:, None, None, 1, 0] * XJ + theta[:, None, None, 1, 1] * YI
              + theta[:, None, None, 1, 2])
        gx = jnp.mod(gx + 1.0, 2.0) - 1.0
        gy = jnp.mod(gy + 1.0, 2.0) - 1.0
        ix = jnp.round((gx + 1.0) * 0.5 * (W - 1)).astype(jnp.int32)
        iy = jnp.round((gy + 1.0) * 0.5 * (H - 1)).astype(jnp.int32)
        inb = (ix >= 0) & (ix < W) & (iy >= 0) & (iy < H)
        idx = jnp.clip(iy, 0, H - 1) * W + jnp.clip(ix, 0, W - 1)
        flat = inp.reshape(N, C, H * W)
        gath = jnp.take_along_axis(
            flat, jnp.broadcast_to(idx.reshape(N, 1, H * W), (N, C, H * W)), axis=2)
        gath = jnp.where(inb.reshape(N, 1, H * W), gath, 0.0)
        return gath.reshape(N, C, H, W)

    def color(inp):
        A = phi[:, :3, :3]
        b = phi[:, :3, 3:]
        xm = inp.reshape(N, C, H * W) * 2.0 - 1.0
        y = jnp.einsum("nij,njp->nip", A, xm) + b
        return ((y + 1.0) * 0.5).reshape(N, C, H, W)

    out = jnp.where(jnp.any(theta != id3), warp(x), x)
    out = jnp.where(jnp.any(phi != id4), color(out), out)
    return out


if __name__ == "__main__":
    key = jax.random.PRNGKey(0)
    k_img, k_aug = jax.random.split(key)
    # (N, C, H, W) with C=3 (color transform requires 3 channels), H=W=16
    x = jax.random.uniform(k_img, (2, 3, 16, 16), dtype=jnp.float32)
    p = 0.8

    y = augmentations_forward(x, k_aug, p)
    y = jax.block_until_ready(y)
    assert y.shape == x.shape
    assert bool(jnp.all(jnp.isfinite(y)))

    # Cross-check against the pure-JAX reference (same theta/phi via the same
    # deterministic key splits).  Tolerate a tiny fraction of pixels that may
    # flip on exact nearest-neighbour rounding boundaries.
    k_theta, k_phi = jax.random.split(k_aug)
    theta = sample_theta(k_theta, x.shape[0], p)
    phi = sample_phi(k_phi, x.shape[0], p)
    y_ref = _reference_apply(x, theta, phi)
    frac_bad = float(jnp.mean((jnp.abs(y - y_ref) > 1e-4).astype(jnp.float32)))
    assert frac_bad < 0.01, f"mismatch fraction vs reference: {frac_bad}"

    print("KERNEL_OK")
</pallas_src>

<mosaic_0001>
module attributes {stable_mosaic.version = 11 : i64} {
  func.func @kernel(%arg0: i32, %arg1: memref<2xi32, #tpu.memory_space<smem>>, %arg2: memref<12xf32, #tpu.memory_space<smem>>, %arg3: memref<24xf32, #tpu.memory_space<smem>>, %arg4: memref<2x48x16xf32, #tpu.memory_space<vmem>>, %arg5: memref<2x3x256xf32, #tpu.memory_space<vmem>>, %arg6: memref<2x3x256xf32, #tpu.memory_space<vmem>>) attributes {dimension_semantics = [#tpu.dimension_semantics<parallel>], iteration_bounds = array<i64: 1>, scalar_prefetch = 0 : i64, scratch_operands = 0 : i64, tpu.core_type = #tpu.core_type<tc>, window_params = [{transform_indices = @transform_0, window_bounds = array<i64: 2>}, {transform_indices = @transform_1, window_bounds = array<i64: 12>}, {transform_indices = @transform_2, window_bounds = array<i64: 24>}, {transform_indices = @transform_3, window_bounds = array<i64: 2, 48, 16>}, {transform_indices = @transform_4, window_bounds = array<i64: 2, 3, 256>}, {transform_indices = @transform_5, window_bounds = array<i64: 2, 3, 256>}]} {
    %c0 = arith.constant 0 : index
    %0 = memref.load %arg1[%c0] : memref<2xi32, #tpu.memory_space<smem>>
    %c0_i32 = arith.constant 0 : i32
    %1 = arith.cmpi ne, %0, %c0_i32 : i32
    %c1 = arith.constant 1 : index
    %2 = memref.load %arg1[%c1] : memref<2xi32, #tpu.memory_space<smem>>
    %c0_i32_0 = arith.constant 0 : i32
    %3 = arith.cmpi ne, %2, %c0_i32_0 : i32
    %4 = arith.extui %1 : i1 to i32
    %c0_i32_1 = arith.constant 0 : i32
    %5 = arith.cmpi ne, %4, %c0_i32_1 : i32
    scf.if %5 {
      %12 = tpu.iota {dimensions = array<i32: 1>} : vector<1x256xi32>
      %c15_i32 = arith.constant 15 : i32
      %13 = vector.broadcast %c15_i32 : i32 to vector<1x256xi32>
      %14 = arith.andi %12, %13 : vector<1x256xi32>
      %c4_i32 = arith.constant 4 : i32
      %15 = vector.broadcast %c4_i32 : i32 to vector<1x256xi32>
      %16 = arith.shrsi %12, %15 : vector<1x256xi32>
      %17 = arith.sitofp %14 : vector<1x256xi32> to vector<1x256xf32>
      %cst = arith.constant 0.13333334 : f32
      %18 = vector.broadcast %cst : f32 to vector<1x256xf32>
      %19 = arith.mulf %17, %18 : vector<1x256xf32>
      %cst_6 = arith.constant 1.000000e+00 : f32
      %20 = vector.broadcast %cst_6 : f32 to vector<1x256xf32>
      %21 = arith.subf %19, %20 : vector<1x256xf32>
      %22 = arith.sitofp %16 : vector<1x256xi32> to vector<1x256xf32>
      %cst_7 = arith.constant 0.13333334 : f32
      %23 = vector.broadcast %cst_7 : f32 to vector<1x256xf32>
      %24 = arith.mulf %22, %23 : vector<1x256xf32>
      %cst_8 = arith.constant 1.000000e+00 : f32
      %25 = vector.broadcast %cst_8 : f32 to vector<1x256xf32>
      %26 = arith.subf %24, %25 : vector<1x256xf32>
      %27 = tpu.iota {dimensions = array<i32: 0>} : vector<16x256xi32>
      %28 = arith.sitofp %27 : vector<16x256xi32> to vector<16x256xf32>
      %29 = tpu.iota {dimensions = array<i32: 0>} : vector<16x256xi32>
      %30 = arith.sitofp %29 : vector<16x256xi32> to vector<16x256xf32>
      %c2_i32 = arith.constant 2 : i32
      %31 = arith.muli %arg0, %c2_i32 : i32
      %c0_i32_9 = arith.constant 0 : i32
      %32 = arith.addi %31, %c0_i32_9 : i32
      %c6_i32 = arith.constant 6 : i32
      %33 = arith.muli %32, %c6_i32 : i32
      %c0_i32_10 = arith.constant 0 : i32
      %34 = arith.addi %33, %c0_i32_10 : i32
      %35 = arith.index_cast %34 : i32 to index
      %36 = memref.load %arg2[%35] : memref<12xf32, #tpu.memory_space<smem>>
      %c1_i32 = arith.constant 1 : i32
      %37 = arith.addi %33, %c1_i32 : i32
      %38 = arith.index_cast %37 : i32 to index
      %39 = memref.load %arg2[%38] : memref<12xf32, #tpu.memory_space<smem>>
      %c2_i32_11 = arith.constant 2 : i32
      %40 = arith.addi %33, %c2_i32_11 : i32
      %41 = arith.index_cast %40 : i32 to index
      %42 = memref.load %arg2[%41] : memref<12xf32, #tpu.memory_space<smem>>
      %c3_i32 = arith.constant 3 : i32
      %43 = arith.addi %33, %c3_i32 : i32
      %44 = arith.index_cast %43 : i32 to index
      %45 = memref.load %arg2[%44] : memref<12xf32, #tpu.memory_space<smem>>
      %c4_i32_12 = arith.constant 4 : i32
      %46 = arith.addi %33, %c4_i32_12 : i32
      %47 = arith.index_cast %46 : i32 to index
      %48 = memref.load %arg2[%47] : memref<12xf32, #tpu.memory_space<smem>>
      %c5_i32 = arith.constant 5 : i32
      %49 = arith.addi %33, %c5_i32 : i32
      %50 = arith.index_cast %49 : i32 to index
      %51 = memref.load %arg2[%50] : memref<12xf32, #tpu.memory_space<smem>>
      %52 = vector.broadcast %36 : f32 to vector<1x256xf32>
      %53 = arith.mulf %52, %21 : vector<1x256xf32>
      %54 = vector.broadcast %39 : f32 to vector<1x256xf32>
      %55 = arith.mulf %54, %26 : vector<1x256xf32>
      %56 = arith.addf %53, %55 : vector<1x256xf32>
      %57 = vector.broadcast %42 : f32 to vector<1x256xf32>
      %58 = arith.addf %56, %57 : vector<1x256xf32>
      %59 = vector.broadcast %45 : f32 to vector<1x256xf32>
      %60 = arith.mulf %59, %21 : vector<1x256xf32>
      %61 = vector.broadcast %48 : f32 to vector<1x256xf32>
      %62 = arith.mulf %61, %26 : vector<1x256xf32>
      %63 = arith.addf %60, %62 : vector<1x256xf32>
      %64 = vector.broadcast %51 : f32 to vector<1x256xf32>
      %65 = arith.addf %63, %64 : vector<1x256xf32>
      %cst_13 = arith.constant 1.000000e+00 : f32
      %66 = vector.broadcast %cst_13 : f32 to vector<1x256xf32>
      %67 = arith.addf %58, %66 : vector<1x256xf32>
      %cst_14 = arith.constant 2.000000e+00 : f32
      %68 = vector.broadcast %cst_14 : f32 to vector<1x256xf32>
      %69 = arith.remf %67, %68 : vector<1x256xf32>
      %cst_15 = arith.constant 0.000000e+00 : f32
      %70 = vector.broadcast %cst_15 : f32 to vector<1x256xf32>
      %71 = arith.cmpf one, %69, %70 : vector<1x256xf32>
      %cst_16 = arith.constant 0.000000e+00 : f32
      %72 = vector.broadcast %cst_16 : f32 to vector<1x256xf32>
      %73 = arith.cmpf olt, %69, %72 : vector<1x256xf32>
      %cst_17 = arith.constant 0.000000e+00 : f32
      %74 = arith.cmpf olt, %cst_14, %cst_17 : f32
      %75 = vector.broadcast %74 : i1 to vector<1x256xi1>
      %76 = vector.broadcast %75 : vector<1x256xi1> to vector<1x256xi1>
      %77 = arith.xori %73, %76 : vector<1x256xi1>
      %78 = arith.andi %77, %71 : vector<1x256xi1>
      %79 = vector.broadcast %cst_14 : f32 to vector<1x256xf32>
      %80 = arith.addf %69, %79 : vector<1x256xf32>
      %81 = arith.select %78, %80, %69 : vector<1x256xi1>, vector<1x256xf32>
      %cst_18 = arith.constant 1.000000e+00 : f32
      %82 = vector.broadcast %cst_18 : f32 to vector<1x256xf32>
      %83 = arith.subf %81, %82 : vector<1x256xf32>
      %cst_19 = arith.constant 1.000000e+00 : f32
      %84 = vector.broadcast %cst_19 : f32 to vector<1x256xf32>
      %85 = arith.addf %65, %84 : vector<1x256xf32>
      %cst_20 = arith.constant 2.000000e+00 : f32
      %86 = vector.broadcast %cst_20 : f32 to vector<1x256xf32>
      %87 = arith.remf %85, %86 : vector<1x256xf32>
      %cst_21 = arith.constant 0.000000e+00 : f32
      %88 = vector.broadcast %cst_21 : f32 to vector<1x256xf32>
      %89 = arith.cmpf one, %87, %88 : vector<1x256xf32>
      %cst_22 = arith.constant 0.000000e+00 : f32
      %90 = vector.broadcast %cst_22 : f32 to vector<1x256xf32>
      %91 = arith.cmpf olt, %87, %90 : vector<1x256xf32>
      %cst_23 = arith.constant 0.000000e+00 : f32
      %92 = arith.cmpf olt, %cst_20, %cst_23 : f32
      %93 = vector.broadcast %92 : i1 to vector<1x256xi1>
      %94 = vector.broadcast %93 : vector<1x256xi1> to vector<1x256xi1>
      %95 = arith.xori %91, %94 : vector<1x256xi1>
      %96 = arith.andi %95, %89 : vector<1x256xi1>
      %97 = vector.broadcast %cst_20 : f32 to vector<1x256xf32>
      %98 = arith.addf %87, %97 : vector<1x256xf32>
      %99 = arith.select %96, %98, %87 : vector<1x256xi1>, vector<1x256xf32>
      %cst_24 = arith.constant 1.000000e+00 : f32
      %100 = vector.broadcast %cst_24 : f32 to vector<1x256xf32>
      %101 = arith.subf %99, %100 : vector<1x256xf32>
      %cst_25 = arith.constant 1.000000e+00 : f32
      %102 = vector.broadcast %cst_25 : f32 to vector<1x256xf32>
      %103 = arith.addf %83, %102 : vector<1x256xf32>
      %cst_26 = arith.constant 5.000000e-01 : f32
      %104 = vector.broadcast %cst_26 : f32 to vector<1x256xf32>
      %105 = arith.mulf %103, %104 : vector<1x256xf32>
      %cst_27 = arith.constant 1.500000e+01 : f32
      %106 = vector.broadcast %cst_27 : f32 to vector<1x256xf32>
      %107 = arith.mulf %105, %106 : vector<1x256xf32>
      %108 = math.roundeven %107 : vector<1x256xf32>
      %cst_28 = arith.constant 1.000000e+00 : f32
      %109 = vector.broadcast %cst_28 : f32 to vector<1x256xf32>
      %110 = arith.addf %101, %109 : vector<1x256xf32>
      %cst_29 = arith.constant 5.000000e-01 : f32
      %111 = vector.broadcast %cst_29 : f32 to vector<1x256xf32>
      %112 = arith.mulf %110, %111 : vector<1x256xf32>
      %cst_30 = arith.constant 1.500000e+01 : f32
      %113 = vector.broadcast %cst_30 : f32 to vector<1x256xf32>
      %114 = arith.mulf %112, %113 : vector<1x256xf32>
      %115 = math.roundeven %114 : vector<1x256xf32>
      %116 = vector.broadcast %108 : vector<1x256xf32> to vector<16x256xf32>
      %117 = arith.cmpf oeq, %30, %116 : vector<16x256xf32>
      %118 = arith.extui %117 : vector<16x256xi1> to vector<16x256xi32>
      %119 = arith.sitofp %118 : vector<16x256xi32> to vector<16x256xf32>
      %120 = vector.broadcast %115 : vector<1x256xf32> to vector<16x256xf32>
      %121 = arith.cmpf oeq, %28, %120 : vector<16x256xf32>
      %122 = arith.extui %121 : vector<16x256xi1> to vector<16x256xi32>
      %123 = arith.sitofp %122 : vector<16x256xi32> to vector<16x256xf32>
      %c0_31 = arith.constant 0 : index
      %c0_32 = arith.constant 0 : index
      %c0_33 = arith.constant 0 : index
      %124 = vector.load %arg4[%c0_31, %c0_32, %c0_33] : memref<2x48x16xf32, #tpu.memory_space<vmem>>, vector<1x48x16xf32>
      %125 = vector.shape_cast %124 : vector<1x48x16xf32> to vector<48x16xf32>
      %cst_34 = arith.constant dense<0.000000e+00> : vector<48x256xf32>
      %126 = tpu.matmul %125, %119, %cst_34 {dimension_numbers = #tpu.dot_dimension_numbers<[1], [0], [0], [1], [0, 0, 1, 1], [], []>} : vector<48x16xf32>, vector<16x256xf32>, vector<48x256xf32> -> vector<48x256xf32>
      %127 = vector.extract_strided_slice %126 {offsets = [0, 0], sizes = [16, 256], strides = [1, 1]} : vector<48x256xf32> to vector<16x256xf32>
      %128 = arith.mulf %127, %123 : vector<16x256xf32>
      %cst_35 = arith.constant dense<0.000000e+00> : vector<256xf32>
      %129 = vector.multi_reduction <add>, %128, %cst_35 [0] : vector<16x256xf32> to vector<256xf32>
      %130 = vector.shape_cast %129 : vector<256xf32> to vector<1x256xf32>
      %131 = vector.extract_strided_slice %126 {offsets = [16, 0], sizes = [16, 256], strides = [1, 1]} : vector<48x256xf32> to vector<16x256xf32>
      %132 = arith.mulf %131, %123 : vector<16x256xf32>
      %cst_36 = arith.constant dense<0.000000e+00> : vector<256xf32>
      %133 = vector.multi_reduction <add>, %132, %cst_36 [0] : vector<16x256xf32> to vector<256xf32>
      %134 = vector.shape_cast %133 : vector<256xf32> to vector<1x256xf32>
      %135 = vector.extract_strided_slice %126 {offsets = [32, 0], sizes = [16, 256], strides = [1, 1]} : vector<48x256xf32> to vector<16x256xf32>
      %136 = arith.mulf %135, %123 : vector<16x256xf32>
      %cst_37 = arith.constant dense<0.000000e+00> : vector<256xf32>
      %137 = vector.multi_reduction <add>, %136, %cst_37 [0] : vector<16x256xf32> to vector<256xf32>
      %138 = vector.shape_cast %137 : vector<256xf32> to vector<1x256xf32>
      %139 = tpu.concatenate %130, %134, %138 in 0 : vector<1x256xf32>, vector<1x256xf32>, vector<1x256xf32> -> vector<3x256xf32>
      %c0_38 = arith.constant 0 : index
      %c0_39 = arith.constant 0 : index
      %c0_40 = arith.constant 0 : index
      %140 = vector.load %arg6[%c0_38, %c0_39, %c0_40] : memref<2x3x256xf32, #tpu.memory_space<vmem>>, vector<1x3x256xf32>
      %141 = vector.shape_cast %140 : vector<1x3x256xf32> to vector<3x256xf32>
      %142 = vector.shape_cast %139 : vector<3x256xf32> to vector<1x3x256xf32>
      tpu.vector_store %arg6[%c0_38, %c0_39, %c0_40], %142 {strides = array<i32>} : memref<2x3x256xf32, #tpu.memory_space<vmem>>, vector<1x3x256xf32>,
      %c2_i32_41 = arith.constant 2 : i32
      %143 = arith.muli %arg0, %c2_i32_41 : i32
      %c1_i32_42 = arith.constant 1 : i32
      %144 = arith.addi %143, %c1_i32_42 : i32
      %c6_i32_43 = arith.constant 6 : i32
      %145 = arith.muli %144, %c6_i32_43 : i32
      %c0_i32_44 = arith.constant 0 : i32
      %146 = arith.addi %145, %c0_i32_44 : i32
      %147 = arith.index_cast %146 : i32 to index
      %148 = memref.load %arg2[%147] : memref<12xf32, #tpu.memory_space<smem>>
      %c1_i32_45 = arith.constant 1 : i32
      %149 = arith.addi %145, %c1_i32_45 : i32
      %150 = arith.index_cast %149 : i32 to index
      %151 = memref.load %arg2[%150] : memref<12xf32, #tpu.memory_space<smem>>
      %c2_i32_46 = arith.constant 2 : i32
      %152 = arith.addi %145, %c2_i32_46 : i32
      %153 = arith.index_cast %152 : i32 to index
      %154 = memref.load %arg2[%153] : memref<12xf32, #tpu.memory_space<smem>>
      %c3_i32_47 = arith.constant 3 : i32
      %155 = arith.addi %145, %c3_i32_47 : i32
      %156 = arith.index_cast %155 : i32 to index
      %157 = memref.load %arg2[%156] : memref<12xf32, #tpu.memory_space<smem>>
      %c4_i32_48 = arith.constant 4 : i32
      %158 = arith.addi %145, %c4_i32_48 : i32
      %159 = arith.index_cast %158 : i32 to index
      %160 = memref.load %arg2[%159] : memref<12xf32, #tpu.memory_space<smem>>
      %c5_i32_49 = arith.constant 5 : i32
      %161 = arith.addi %145, %c5_i32_49 : i32
      %162 = arith.index_cast %161 : i32 to index
      %163 = memref.load %arg2[%162] : memref<12xf32, #tpu.memory_space<smem>>
      %164 = vector.broadcast %148 : f32 to vector<1x256xf32>
      %165 = arith.mulf %164, %21 : vector<1x256xf32>
      %166 = vector.broadcast %151 : f32 to vector<1x256xf32>
      %167 = arith.mulf %166, %26 : vector<1x256xf32>
      %168 = arith.addf %165, %167 : vector<1x256xf32>
      %169 = vector.broadcast %154 : f32 to vector<1x256xf32>
      %170 = arith.addf %168, %169 : vector<1x256xf32>
      %171 = vector.broadcast %157 : f32 to vector<1x256xf32>
      %172 = arith.mulf %171, %21 : vector<1x256xf32>
      %173 = vector.broadcast %160 : f32 to vector<1x256xf32>
      %174 = arith.mulf %173, %26 : vector<1x256xf32>
      %175 = arith.addf %172, %174 : vector<1x256xf32>
      %176 = vector.broadcast %163 : f32 to vector<1x256xf32>
      %177 = arith.addf %175, %176 : vector<1x256xf32>
      %cst_50 = arith.constant 1.000000e+00 : f32
      %178 = vector.broadcast %cst_50 : f32 to vector<1x256xf32>
      %179 = arith.addf %170, %178 : vector<1x256xf32>
      %cst_51 = arith.constant 2.000000e+00 : f32
      %180 = vector.broadcast %cst_51 : f32 to vector<1x256xf32>
      %181 = arith.remf %179, %180 : vector<1x256xf32>
      %cst_52 = arith.constant 0.000000e+00 : f32
      %182 = vector.broadcast %cst_52 : f32 to vector<1x256xf32>
      %183 = arith.cmpf one, %181, %182 : vector<1x256xf32>
      %cst_53 = arith.constant 0.000000e+00 : f32
      %184 = vector.broadcast %cst_53 : f32 to vector<1x256xf32>
      %185 = arith.cmpf olt, %181, %184 : vector<1x256xf32>
      %cst_54 = arith.constant 0.000000e+00 : f32
      %186 = arith.cmpf olt, %cst_51, %cst_54 : f32
      %187 = vector.broadcast %186 : i1 to vector<1x256xi1>
      %188 = vector.broadcast %187 : vector<1x256xi1> to vector<1x256xi1>
      %189 = arith.xori %185, %188 : vector<1x256xi1>
      %190 = arith.andi %189, %183 : vector<1x256xi1>
      %191 = vector.broadcast %cst_51 : f32 to vector<1x256xf32>
      %192 = arith.addf %181, %191 : vector<1x256xf32>
      %193 = arith.select %190, %192, %181 : vector<1x256xi1>, vector<1x256xf32>
      %cst_55 = arith.constant 1.000000e+00 : f32
      %194 = vector.broadcast %cst_55 : f32 to vector<1x256xf32>
      %195 = arith.subf %193, %194 : vector<1x256xf32>
      %cst_56 = arith.constant 1.000000e+00 : f32
      %196 = vector.broadcast %cst_56 : f32 to vector<1x256xf32>
      %197 = arith.addf %177, %196 : vector<1x256xf32>
      %cst_57 = arith.constant 2.000000e+00 : f32
      %198 = vector.broadcast %cst_57 : f32 to vector<1x256xf32>
      %199 = arith.remf %197, %198 : vector<1x256xf32>
      %cst_58 = arith.constant 0.000000e+00 : f32
      %200 = vector.broadcast %cst_58 : f32 to vector<1x256xf32>
      %201 = arith.cmpf one, %199, %200 : vector<1x256xf32>
      %cst_59 = arith.constant 0.000000e+00 : f32
      %202 = vector.broadcast %cst_59 : f32 to vector<1x256xf32>
      %203 = arith.cmpf olt, %199, %202 : vector<1x256xf32>
      %cst_60 = arith.constant 0.000000e+00 : f32
      %204 = arith.cmpf olt, %cst_57, %cst_60 : f32
      %205 = vector.broadcast %204 : i1 to vector<1x256xi1>
      %206 = vector.broadcast %205 : vector<1x256xi1> to vector<1x256xi1>
      %207 = arith.xori %203, %206 : vector<1x256xi1>
      %208 = arith.andi %207, %201 : vector<1x256xi1>
      %209 = vector.broadcast %cst_57 : f32 to vector<1x256xf32>
      %210 = arith.addf %199, %209 : vector<1x256xf32>
      %211 = arith.select %208, %210, %199 : vector<1x256xi1>, vector<1x256xf32>
      %cst_61 = arith.constant 1.000000e+00 : f32
      %212 = vector.broadcast %cst_61 : f32 to vector<1x256xf32>
      %213 = arith.subf %211, %212 : vector<1x256xf32>
      %cst_62 = arith.constant 1.000000e+00 : f32
      %214 = vector.broadcast %cst_62 : f32 to vector<1x256xf32>
      %215 = arith.addf %195, %214 : vector<1x256xf32>
      %cst_63 = arith.constant 5.000000e-01 : f32
      %216 = vector.broadcast %cst_63 : f32 to vector<1x256xf32>
      %217 = arith.mulf %215, %216 : vector<1x256xf32>
      %cst_64 = arith.constant 1.500000e+01 : f32
      %218 = vector.broadcast %cst_64 : f32 to vector<1x256xf32>
      %219 = arith.mulf %217, %218 : vector<1x256xf32>
      %220 = math.roundeven %219 : vector<1x256xf32>
      %cst_65 = arith.constant 1.000000e+00 : f32
      %221 = vector.broadcast %cst_65 : f32 to vector<1x256xf32>
      %222 = arith.addf %213, %221 : vector<1x256xf32>
      %cst_66 = arith.constant 5.000000e-01 : f32
      %223 = vector.broadcast %cst_66 : f32 to vector<1x256xf32>
      %224 = arith.mulf %222, %223 : vector<1x256xf32>
      %cst_67 = arith.constant 1.500000e+01 : f32
      %225 = vector.broadcast %cst_67 : f32 to vector<1x256xf32>
      %226 = arith.mulf %224, %225 : vector<1x256xf32>
      %227 = math.roundeven %226 : vector<1x256xf32>
      %228 = vector.broadcast %220 : vector<1x256xf32> to vector<16x256xf32>
      %229 = arith.cmpf oeq, %30, %228 : vector<16x256xf32>
      %230 = arith.extui %229 : vector<16x256xi1> to vector<16x256xi32>
      %231 = arith.sitofp %230 : vector<16x256xi32> to vector<16x256xf32>
      %232 = vector.broadcast %227 : vector<1x256xf32> to vector<16x256xf32>
      %233 = arith.cmpf oeq, %28, %232 : vector<16x256xf32>
      %234 = arith.extui %233 : vector<16x256xi1> to vector<16x256xi32>
      %235 = arith.sitofp %234 : vector<16x256xi32> to vector<16x256xf32>
      %c1_68 = arith.constant 1 : index
      %c0_69 = arith.constant 0 : index
      %c0_70 = arith.constant 0 : index
      %236 = vector.load %arg4[%c1_68, %c0_69, %c0_70] : memref<2x48x16xf32, #tpu.memory_space<vmem>>, vector<1x48x16xf32>
      %237 = vector.shape_cast %236 : vector<1x48x16xf32> to vector<48x16xf32>
      %cst_71 = arith.constant dense<0.000000e+00> : vector<48x256xf32>
      %238 = tpu.matmul %237, %231, %cst_71 {dimension_numbers = #tpu.dot_dimension_numbers<[1], [0], [0], [1], [0, 0, 1, 1], [], []>} : vector<48x16xf32>, vector<16x256xf32>, vector<48x256xf32> -> vector<48x256xf32>
      %239 = vector.extract_strided_slice %238 {offsets = [0, 0], sizes = [16, 256], strides = [1, 1]} : vector<48x256xf32> to vector<16x256xf32>
      %240 = arith.mulf %239, %235 : vector<16x256xf32>
      %cst_72 = arith.constant dense<0.000000e+00> : vector<256xf32>
      %241 = vector.multi_reduction <add>, %240, %cst_72 [0] : vector<16x256xf32> to vector<256xf32>
      %242 = vector.shape_cast %241 : vector<256xf32> to vector<1x256xf32>
      %243 = vector.extract_strided_slice %238 {offsets = [16, 0], sizes = [16, 256], strides = [1, 1]} : vector<48x256xf32> to vector<16x256xf32>
      %244 = arith.mulf %243, %235 : vector<16x256xf32>
      %cst_73 = arith.constant dense<0.000000e+00> : vector<256xf32>
      %245 = vector.multi_reduction <add>, %244, %cst_73 [0] : vector<16x256xf32> to vector<256xf32>
      %246 = vector.shape_cast %245 : vector<256xf32> to vector<1x256xf32>
      %247 = vector.extract_strided_slice %238 {offsets = [32, 0], sizes = [16, 256], strides = [1, 1]} : vector<48x256xf32> to vector<16x256xf32>
      %248 = arith.mulf %247, %235 : vector<16x256xf32>
      %cst_74 = arith.constant dense<0.000000e+00> : vector<256xf32>
      %249 = vector.multi_reduction <add>, %248, %cst_74 [0] : vector<16x256xf32> to vector<256xf32>
      %250 = vector.shape_cast %249 : vector<256xf32> to vector<1x256xf32>
      %251 = tpu.concatenate %242, %246, %250 in 0 : vector<1x256xf32>, vector<1x256xf32>, vector<1x256xf32> -> vector<3x256xf32>
      %c1_75 = arith.constant 1 : index
      %c0_76 = arith.constant 0 : index
      %c0_77 = arith.constant 0 : index
      %252 = vector.load %arg6[%c1_75, %c0_76, %c0_77] : memref<2x3x256xf32, #tpu.memory_space<vmem>>, vector<1x3x256xf32>
      %253 = vector.shape_cast %252 : vector<1x3x256xf32> to vector<3x256xf32>
      %254 = vector.shape_cast %251 : vector<3x256xf32> to vector<1x3x256xf32>
      tpu.vector_store %arg6[%c1_75, %c0_76, %c0_77], %254 {strides = array<i32>} : memref<2x3x256xf32, #tpu.memory_space<vmem>>, vector<1x3x256xf32>,
    } else {
    }
    %c0_2 = arith.constant 0 : index
    %6 = memref.load %arg1[%c0_2] : memref<2xi32, #tpu.memory_space<smem>>
    %c0_i32_3 = arith.constant 0 : i32
    %7 = arith.cmpi eq, %6, %c0_i32_3 : i32
    %8 = arith.extui %7 : i1 to i32
    %c0_i32_4 = arith.constant 0 : i32
    %9 = arith.cmpi ne, %8, %c0_i32_4 : i32
    scf.if %9 {
      %c0_6 = arith.constant 0 : index
      %c0_7 = arith.constant 0 : index
      %c0_8 = arith.constant 0 : index
      %12 = vector.load %arg5[%c0_6, %c0_7, %c0_8] : memref<2x3x256xf32, #tpu.memory_space<vmem>>, vector<2x3x256xf32>
      %c0_9 = arith.constant 0 : index
      %c0_10 = arith.constant 0 : index
      %c0_11 = arith.constant 0 : index
      %13 = vector.load %arg6[%c0_9, %c0_10, %c0_11] : memref<2x3x256xf32, #tpu.memory_space<vmem>>, vector<2x3x256xf32>
      tpu.vector_store %arg6[%c0_9, %c0_10, %c0_11], %12 {strides = array<i32>} : memref<2x3x256xf32, #tpu.memory_space<vmem>>, vector<2x3x256xf32>,
    } else {
    }
    %10 = arith.extui %3 : i1 to i32
    %c0_i32_5 = arith.constant 0 : i32
    %11 = arith.cmpi ne, %10, %c0_i32_5 : i32
    scf.if %11 {
      %c2_i32 = arith.constant 2 : i32
      %12 = arith.muli %arg0, %c2_i32 : i32
      %c0_i32_6 = arith.constant 0 : i32
      %13 = arith.addi %12, %c0_i32_6 : i32
      %c12_i32 = arith.constant 12 : i32
      %14 = arith.muli %13, %c12_i32 : i32
      %c0_i32_7 = arith.constant 0 : i32
      %15 = arith.addi %14, %c0_i32_7 : i32
      %16 = arith.index_cast %15 : i32 to index
      %17 = memref.load %arg3[%16] : memref<24xf32, #tpu.memory_space<smem>>
      %c1_i32 = arith.constant 1 : i32
      %18 = arith.addi %14, %c1_i32 : i32
      %19 = arith.index_cast %18 : i32 to index
      %20 = memref.load %arg3[%19] : memref<24xf32, #tpu.memory_space<smem>>
      %c2_i32_8 = arith.constant 2 : i32
      %21 = arith.addi %14, %c2_i32_8 : i32
      %22 = arith.index_cast %21 : i32 to index
      %23 = memref.load %arg3[%22] : memref<24xf32, #tpu.memory_space<smem>>
      %c3_i32 = arith.constant 3 : i32
      %24 = arith.addi %14, %c3_i32 : i32
      %25 = arith.index_cast %24 : i32 to index
      %26 = memref.load %arg3[%25] : memref<24xf32, #tpu.memory_space<smem>>
      %c4_i32 = arith.constant 4 : i32
      %27 = arith.addi %14, %c4_i32 : i32
      %28 = arith.index_cast %27 : i32 to index
      %29 = memref.load %arg3[%28] : memref<24xf32, #tpu.memory_space<smem>>
      %c5_i32 = arith.constant 5 : i32
      %30 = arith.addi %14, %c5_i32 : i32
      %31 = arith.index_cast %30 : i32 to index
      %32 = memref.load %arg3[%31] : memref<24xf32, #tpu.memory_space<smem>>
      %c6_i32 = arith.constant 6 : i32
      %33 = arith.addi %14, %c6_i32 : i32
      %34 = arith.index_cast %33 : i32 to index
      %35 = memref.load %arg3[%34] : memref<24xf32, #tpu.memory_space<smem>>
      %c7_i32 = arith.constant 7 : i32
      %36 = arith.addi %14, %c7_i32 : i32
      %37 = arith.index_cast %36 : i32 to index
      %38 = memref.load %arg3[%37] : memref<24xf32, #tpu.memory_space<smem>>
      %c8_i32 = arith.constant 8 : i32
      %39 = arith.addi %14, %c8_i32 : i32
      %40 = arith.index_cast %39 : i32 to index
      %41 = memref.load %arg3[%40] : memref<24xf32, #tpu.memory_space<smem>>
      %c9_i32 = arith.constant 9 : i32
      %42 = arith.addi %14, %c9_i32 : i32
      %43 = arith.index_cast %42 : i32 to index
      %44 = memref.load %arg3[%43] : memref<24xf32, #tpu.memory_space<smem>>
      %c10_i32 = arith.constant 10 : i32
      %45 = arith.addi %14, %c10_i32 : i32
      %46 = arith.index_cast %45 : i32 to index
      %47 = memref.load %arg3[%46] : memref<24xf32, #tpu.memory_space<smem>>
      %c11_i32 = arith.constant 11 : i32
      %48 = arith.addi %14, %c11_i32 : i32
      %49 = arith.index_cast %48 : i32 to index
      %50 = memref.load %arg3[%49] : memref<24xf32, #tpu.memory_space<smem>>
      %c0_9 = arith.constant 0 : index
      %c0_10 = arith.constant 0 : index
      %c0_11 = arith.constant 0 : index
      %51 = vector.load %arg6[%c0_9, %c0_10, %c0_11] : memref<2x3x256xf32, #tpu.memory_space<vmem>>, vector<1x3x256xf32>
      %52 = vector.shape_cast %51 : vector<1x3x256xf32> to vector<3x256xf32>
      %cst = arith.constant 2.000000e+00 : f32
      %53 = vector.broadcast %cst : f32 to vector<3x256xf32>
      %54 = arith.mulf %52, %53 : vector<3x256xf32>
      %cst_12 = arith.constant 1.000000e+00 : f32
      %55 = vector.broadcast %cst_12 : f32 to vector<3x256xf32>
      %56 = arith.subf %54, %55 : vector<3x256xf32>
      %57 = vector.extract_strided_slice %56 {offsets = [0, 0], sizes = [1, 256], strides = [1, 1]} : vector<3x256xf32> to vector<1x256xf32>
      %58 = vector.extract_strided_slice %56 {offsets = [1, 0], sizes = [1, 256], strides = [1, 1]} : vector<3x256xf32> to vector<1x256xf32>
      %59 = vector.extract_strided_slice %56 {offsets = [2, 0], sizes = [1, 256], strides = [1, 1]} : vector<3x256xf32> to vector<1x256xf32>
      %60 = vector.broadcast %17 : f32 to vector<1x256xf32>
      %61 = arith.mulf %60, %57 : vector<1x256xf32>
      %62 = vector.broadcast %20 : f32 to vector<1x256xf32>
      %63 = arith.mulf %62, %58 : vector<1x256xf32>
      %64 = arith.addf %61, %63 : vector<1x256xf32>
      %65 = vector.broadcast %23 : f32 to vector<1x256xf32>
      %66 = arith.mulf %65, %59 : vector<1x256xf32>
      %67 = arith.addf %64, %66 : vector<1x256xf32>
      %68 = vector.broadcast %26 : f32 to vector<1x256xf32>
      %69 = arith.addf %67, %68 : vector<1x256xf32>
      %70 = vector.broadcast %29 : f32 to vector<1x256xf32>
      %71 = arith.mulf %70, %57 : vector<1x256xf32>
      %72 = vector.broadcast %32 : f32 to vector<1x256xf32>
      %73 = arith.mulf %72, %58 : vector<1x256xf32>
      %74 = arith.addf %71, %73 : vector<1x256xf32>
      %75 = vector.broadcast %35 : f32 to vector<1x256xf32>
      %76 = arith.mulf %75, %59 : vector<1x256xf32>
      %77 = arith.addf %74, %76 : vector<1x256xf32>
      %78 = vector.broadcast %38 : f32 to vector<1x256xf32>
      %79 = arith.addf %77, %78 : vector<1x256xf32>
      %80 = vector.broadcast %41 : f32 to vector<1x256xf32>
      %81 = arith.mulf %80, %57 : vector<1x256xf32>
      %82 = vector.broadcast %44 : f32 to vector<1x256xf32>
      %83 = arith.mulf %82, %58 : vector<1x256xf32>
      %84 = arith.addf %81, %83 : vector<1x256xf32>
      %85 = vector.broadcast %47 : f32 to vector<1x256xf32>
      %86 = arith.mulf %85, %59 : vector<1x256xf32>
      %87 = arith.addf %84, %86 : vector<1x256xf32>
      %88 = vector.broadcast %50 : f32 to vector<1x256xf32>
      %89 = arith.addf %87, %88 : vector<1x256xf32>
      %90 = tpu.concatenate %69, %79, %89 in 0 : vector<1x256xf32>, vector<1x256xf32>, vector<1x256xf32> -> vector<3x256xf32>
      %cst_13 = arith.constant 1.000000e+00 : f32
      %91 = vector.broadcast %cst_13 : f32 to vector<3x256xf32>
      %92 = arith.addf %90, %91 : vector<3x256xf32>
      %cst_14 = arith.constant 5.000000e-01 : f32
      %93 = vector.broadcast %cst_14 : f32 to vector<3x256xf32>
      %94 = arith.mulf %92, %93 : vector<3x256xf32>
      %c0_15 = arith.constant 0 : index
      %c0_16 = arith.constant 0 : index
      %c0_17 = arith.constant 0 : index
      %95 = vector.load %arg6[%c0_15, %c0_16, %c0_17] : memref<2x3x256xf32, #tpu.memory_space<vmem>>, vector<1x3x256xf32>
      %96 = vector.shape_cast %95 : vector<1x3x256xf32> to vector<3x256xf32>
      %97 = vector.shape_cast %94 : vector<3x256xf32> to vector<1x3x256xf32>
      tpu.vector_store %arg6[%c0_15, %c0_16, %c0_17], %97 {strides = array<i32>} : memref<2x3x256xf32, #tpu.memory_space<vmem>>, vector<1x3x256xf32>,
      %c2_i32_18 = arith.constant 2 : i32
      %98 = arith.muli %arg0, %c2_i32_18 : i32
      %c1_i32_19 = arith.constant 1 : i32
      %99 = arith.addi %98, %c1_i32_19 : i32
      %c12_i32_20 = arith.constant 12 : i32
      %100 = arith.muli %99, %c12_i32_20 : i32
      %c0_i32_21 = arith.constant 0 : i32
      %101 = arith.addi %100, %c0_i32_21 : i32
      %102 = arith.index_cast %101 : i32 to index
      %103 = memref.load %arg3[%102] : memref<24xf32, #tpu.memory_space<smem>>
      %c1_i32_22 = arith.constant 1 : i32
      %104 = arith.addi %100, %c1_i32_22 : i32
      %105 = arith.index_cast %104 : i32 to index
      %106 = memref.load %arg3[%105] : memref<24xf32, #tpu.memory_space<smem>>
      %c2_i32_23 = arith.constant 2 : i32
      %107 = arith.addi %100, %c2_i32_23 : i32
      %108 = arith.index_cast %107 : i32 to index
      %109 = memref.load %arg3[%108] : memref<24xf32, #tpu.memory_space<smem>>
      %c3_i32_24 = arith.constant 3 : i32
      %110 = arith.addi %100, %c3_i32_24 : i32
      %111 = arith.index_cast %110 : i32 to index
      %112 = memref.load %arg3[%111] : memref<24xf32, #tpu.memory_space<smem>>
      %c4_i32_25 = arith.constant 4 : i32
      %113 = arith.addi %100, %c4_i32_25 : i32
      %114 = arith.index_cast %113 : i32 to index
      %115 = memref.load %arg3[%114] : memref<24xf32, #tpu.memory_space<smem>>
      %c5_i32_26 = arith.constant 5 : i32
      %116 = arith.addi %100, %c5_i32_26 : i32
      %117 = arith.index_cast %116 : i32 to index
      %118 = memref.load %arg3[%117] : memref<24xf32, #tpu.memory_space<smem>>
      %c6_i32_27 = arith.constant 6 : i32
      %119 = arith.addi %100, %c6_i32_27 : i32
      %120 = arith.index_cast %119 : i32 to index
      %121 = memref.load %arg3[%120] : memref<24xf32, #tpu.memory_space<smem>>
      %c7_i32_28 = arith.constant 7 : i32
      %122 = arith.addi %100, %c7_i32_28 : i32
      %123 = arith.index_cast %122 : i32 to index
      %124 = memref.load %arg3[%123] : memref<24xf32, #tpu.memory_space<smem>>
      %c8_i32_29 = arith.constant 8 : i32
      %125 = arith.addi %100, %c8_i32_29 : i32
      %126 = arith.index_cast %125 : i32 to index
      %127 = memref.load %arg3[%126] : memref<24xf32, #tpu.memory_space<smem>>
      %c9_i32_30 = arith.constant 9 : i32
      %128 = arith.addi %100, %c9_i32_30 : i32
      %129 = arith.index_cast %128 : i32 to index
      %130 = memref.load %arg3[%129] : memref<24xf32, #tpu.memory_space<smem>>
      %c10_i32_31 = arith.constant 10 : i32
      %131 = arith.addi %100, %c10_i32_31 : i32
      %132 = arith.index_cast %131 : i32 to index
      %133 = memref.load %arg3[%132] : memref<24xf32, #tpu.memory_space<smem>>
      %c11_i32_32 = arith.constant 11 : i32
      %134 = arith.addi %100, %c11_i32_32 : i32
      %135 = arith.index_cast %134 : i32 to index
      %136 = memref.load %arg3[%135] : memref<24xf32, #tpu.memory_space<smem>>
      %c1_33 = arith.constant 1 : index
      %c0_34 = arith.constant 0 : index
      %c0_35 = arith.constant 0 : index
      %137 = vector.load %arg6[%c1_33, %c0_34, %c0_35] : memref<2x3x256xf32, #tpu.memory_space<vmem>>, vector<1x3x256xf32>
      %138 = vector.shape_cast %137 : vector<1x3x256xf32> to vector<3x256xf32>
      %cst_36 = arith.constant 2.000000e+00 : f32
      %139 = vector.broadcast %cst_36 : f32 to vector<3x256xf32>
      %140 = arith.mulf %138, %139 : vector<3x256xf32>
      %cst_37 = arith.constant 1.000000e+00 : f32
      %141 = vector.broadcast %cst_37 : f32 to vector<3x256xf32>
      %142 = arith.subf %140, %141 : vector<3x256xf32>
      %143 = vector.extract_strided_slice %142 {offsets = [0, 0], sizes = [1, 256], strides = [1, 1]} : vector<3x256xf32> to vector<1x256xf32>
      %144 = vector.extract_strided_slice %142 {offsets = [1, 0], sizes = [1, 256], strides = [1, 1]} : vector<3x256xf32> to vector<1x256xf32>
      %145 = vector.extract_strided_slice %142 {offsets = [2, 0], sizes = [1, 256], strides = [1, 1]} : vector<3x256xf32> to vector<1x256xf32>
      %146 = vector.broadcast %103 : f32 to vector<1x256xf32>
      %147 = arith.mulf %146, %143 : vector<1x256xf32>
      %148 = vector.broadcast %106 : f32 to vector<1x256xf32>
      %149 = arith.mulf %148, %144 : vector<1x256xf32>
      %150 = arith.addf %147, %149 : vector<1x256xf32>
      %151 = vector.broadcast %109 : f32 to vector<1x256xf32>
      %152 = arith.mulf %151, %145 : vector<1x256xf32>
      %153 = arith.addf %150, %152 : vector<1x256xf32>
      %154 = vector.broadcast %112 : f32 to vector<1x256xf32>
      %155 = arith.addf %153, %154 : vector<1x256xf32>
      %156 = vector.broadcast %115 : f32 to vector<1x256xf32>
      %157 = arith.mulf %156, %143 : vector<1x256xf32>
      %158 = vector.broadcast %118 : f32 to vector<1x256xf32>
      %159 = arith.mulf %158, %144 : vector<1x256xf32>
      %160 = arith.addf %157, %159 : vector<1x256xf32>
      %161 = vector.broadcast %121 : f32 to vector<1x256xf32>
      %162 = arith.mulf %161, %145 : vector<1x256xf32>
      %163 = arith.addf %160, %162 : vector<1x256xf32>
      %164 = vector.broadcast %124 : f32 to vector<1x256xf32>
      %165 = arith.addf %163, %164 : vector<1x256xf32>
      %166 = vector.broadcast %127 : f32 to vector<1x256xf32>
      %167 = arith.mulf %166, %143 : vector<1x256xf32>
      %168 = vector.broadcast %130 : f32 to vector<1x256xf32>
      %169 = arith.mulf %168, %144 : vector<1x256xf32>
      %170 = arith.addf %167, %169 : vector<1x256xf32>
      %171 = vector.broadcast %133 : f32 to vector<1x256xf32>
      %172 = arith.mulf %171, %145 : vector<1x256xf32>
      %173 = arith.addf %170, %172 : vector<1x256xf32>
      %174 = vector.broadcast %136 : f32 to vector<1x256xf32>
      %175 = arith.addf %173, %174 : vector<1x256xf32>
      %176 = tpu.concatenate %155, %165, %175 in 0 : vector<1x256xf32>, vector<1x256xf32>, vector<1x256xf32> -> vector<3x256xf32>
      %cst_38 = arith.constant 1.000000e+00 : f32
      %177 = vector.broadcast %cst_38 : f32 to vector<3x256xf32>
      %178 = arith.addf %176, %177 : vector<3x256xf32>
      %cst_39 = arith.constant 5.000000e-01 : f32
      %179 = vector.broadcast %cst_39 : f32 to vector<3x256xf32>
      %180 = arith.mulf %178, %179 : vector<3x256xf32>
      %c1_40 = arith.constant 1 : index
      %c0_41 = arith.constant 0 : index
      %c0_42 = arith.constant 0 : index
      %181 = vector.load %arg6[%c1_40, %c0_41, %c0_42] : memref<2x3x256xf32, #tpu.memory_space<vmem>>, vector<1x3x256xf32>
      %182 = vector.shape_cast %181 : vector<1x3x256xf32> to vector<3x256xf32>
      %183 = vector.shape_cast %180 : vector<3x256xf32> to vector<1x3x256xf32>
      tpu.vector_store %arg6[%c1_40, %c0_41, %c0_42], %183 {strides = array<i32>} : memref<2x3x256xf32, #tpu.memory_space<vmem>>, vector<1x3x256xf32>,
    } else {
    }
    return
  }
  func.func @transform_0(%arg0: i32) -> i32 {
    %c0_i32 = arith.constant 0 : i32
    %c0_i32_0 = arith.constant 0 : i32
    return %c0_i32 : i32
  }
  func.func @transform_1(%arg0: i32) -> i32 {
    %c0_i32 = arith.constant 0 : i32
    %c0_i32_0 = arith.constant 0 : i32
    return %c0_i32 : i32
  }
  func.func @transform_2(%arg0: i32) -> i32 {
    %c0_i32 = arith.constant 0 : i32
    %c0_i32_0 = arith.constant 0 : i32
    return %c0_i32 : i32
  }
  func.func @transform_3(%arg0: i32) -> (i32, i32, i32) {
    %c0_i32 = arith.constant 0 : i32
    %c0_i32_0 = arith.constant 0 : i32
    %c0_i32_1 = arith.constant 0 : i32
    return %arg0, %c0_i32, %c0_i32_0 : i32, i32, i32
  }
  func.func @transform_4(%arg0: i32) -> (i32, i32, i32) {
    %c0_i32 = arith.constant 0 : i32
    %c0_i32_0 = arith.constant 0 : i32
    %c0_i32_1 = arith.constant 0 : i32
    return %arg0, %c0_i32, %c0_i32_0 : i32, i32, i32
  }
  func.func @transform_5(%arg0: i32) -> (i32, i32, i32) {
    %c0_i32 = arith.constant 0 : i32
    %c0_i32_0 = arith.constant 0 : i32
    %c0_i32_1 = arith.constant 0 : i32
    return %arg0, %c0_i32, %c0_i32_0 : i32, i32, i32
  }
}

</mosaic_0001>

<bundles_post_ra>
// kernel: augmentations_forward.111
= control target key start
LH: loop header
LB: loop body
LE: loop exit
PB: predicated region body
PF: predicated region fallthrough
CT: control target
= control target key end

     0   :  { %10 = vsyncpa [#allocation3], 0  ;;  %s1551_s0 = inlined_call_operand.vmem [shape: s32[2], index: 0, kind: input, shape index: {}]   ;;  %s1552_s1 = inlined_call_operand.vmem [shape: f32[12], index: 1, kind: input, shape index: {}]   ;;  %s1553_s2 = inlined_call_operand.vmem [shape: f32[24], index: 2, kind: input, shape index: {}]   ;;  %s1554_s3 = inlined_call_operand.vmem [shape: f32[2,48,16], index: 3, kind: input, shape index: {}]   ;;  %s1555_s4 = inlined_call_operand.vmem [shape: f32[2,3,256], index: 4, kind: input, shape index: {}]   ;;  %s1556_s5 = inlined_call_operand.vmem [shape: f32[2,3,256], index: 5, kind: output, shape index: {}]  }
   0x1   :  { %11 = vsyncpa [#allocation5], 0  ;;  %s28_s20 = sshll.u32 %s1552_s1, 4  ;;  %s18_s23 = sshll.u32 %s1551_s0, 4  ;;  %s29_s20 = int_to_ptr.vmem [resolvable:$true] %s28_s20  ;;  %s19_s23 = int_to_ptr.vmem [resolvable:$true] %s18_s23 }
   0x2   :  { %s1169_s24 = scalar_lea.vmem %s29_s20, 16  ;;  %p1174_p1 = scmp.lt.s32.totalorder %s29_s20, %s29_s20 }
   0x3   :  { %p1170_p0 = scmp.ne.s32.totalorder %s29_s20, %s1169_s24  ;;  %p1175_p2 = scmp.lt.s32.totalorder %s1169_s24, %s1169_s24 }
   0x5   :  { %p1176_p3 = por %p1175_p2, %p1174_p1 }
   0x7   :  { %p1177_p4 = pnand %p1176_p3, %p1170_p0 }
   0x9   :  { %1180 = shalt.err (!%p1177_p4)
}
   0xa   :  { %s1209_s25 = smov [#allocation4]   ;;  %s1181_s26 = scalar_lea.vmem %s19_s23, 16 }
   0xb   :  { %31 = dma.vmem_to_smem %s29_s20, 16, %s1209_s25, [#allocation5]  }
   0xc   :  { %p1182_p5 = scmp.ne.s32.totalorder %s19_s23, %s1181_s26  ;;  %p1186_p6 = scmp.lt.s32.totalorder %s19_s23, %s19_s23 }
   0xd   :  { %p1187_p7 = scmp.lt.s32.totalorder %s1181_s26, %s1181_s26 }
   0xf   :  { %p1188_p8 = por %p1187_p7, %p1186_p6 }
  0x11   :  { %p1189_p9 = pnand %p1188_p8, %p1182_p5 }
  0x13   :  { %1192 = shalt.err (!%p1189_p9)
}
  0x14   :  { %s1210_s1 = smov [#allocation2]   ;;  %s38_s28 = sshll.u32 %s1553_s2, 4  ;;  %s39_s28 = int_to_ptr.vmem [resolvable:$true] %s38_s28 }
  0x15   :  { %21 = dma.vmem_to_smem %s19_s23, 16, %s1210_s1, [#allocation3]  }
  0x16   :  { %s1193_s29 = scalar_lea.vmem %s39_s28, 16  ;;  %p1198_p11 = scmp.lt.s32.totalorder %s39_s28, %s39_s28 }
  0x17   :  { %p1194_p10 = scmp.ne.s32.totalorder %s39_s28, %s1193_s29  ;;  %p1199_p12 = scmp.lt.s32.totalorder %s1193_s29, %s1193_s29 }
  0x19   :  { %p1200_p13 = por %p1199_p12, %p1198_p11 }
  0x1b   :  { %p1201_p0 = pnand %p1200_p13, %p1194_p10 }
  0x1d   :  { %1204 = shalt.err (!%p1201_p0)
}
  0x1e   :  { %s1211_s30 = smov [#allocation6]  }
  0x1f   :  { %41 = dma.vmem_to_smem %s39_s28, 16, %s1211_s30, [#allocation5]  }
  0x20   :  { %1205 = dma.done.wait [#allocation3], 16  }
  0x21   :  { %1206 = vsyncadd [#allocation3], 4294967280 }
  0x22   :  { %1207 = dma.done.wait [#allocation5], 32  }
  0x23   :  { %1208 = vsyncadd [#allocation5], 4294967264 }
  0x24   :  { %55 = sfence }
  0x25   :  { %s56_s6 = sld [smem:[#allocation2]]  ;;  %s1253_s7 = sld [smem:[#allocation2 + $0x1]] }
  0x2b   :  { %p1040_p1 = scmp.eq.s32.totalorder %s56_s6, 0 }
  0x2c   :  { %v63_v0 = vlaneseq (!%p1040_p1)  ;;  %s1256_s2 = sld [smem:[#allocation4]] (!%p1040_p1)  ;;  %s1258_s8 = sld [smem:[#allocation4 + $0x6]] (!%p1040_p1)  ;;  %v1212_v2 = vmov (!%p1040_p1), 0.0  }
  0x2d   :  { %62 = sbr.rel (%p1040_p1) target bundleno = 358 (0x166), region = 37  ;;  %322 = vmatprep.mubr.f32.mxu0 (!%p1040_p1), %v1212_v2  ;;  %661 = vmatprep.mubr.f32.mxu1 (!%p1040_p1), %v1212_v2  ;;  %s1262_s9 = sld [smem:[#allocation4 + $0x1]] (!%p1040_p1) }
  0x2e   :  { %v64_v1 = vand.u32 (!%p1040_p1), 127, %v63_v0  ;;  %s1264_s10 = sld [smem:[#allocation4 + $0x7]] (!%p1040_p1)  ;;  %s1266_s11 = sld [smem:[#allocation4 + $0x2]] (!%p1040_p1) }
  0x2f   :  { %s1268_s12 = sld [smem:[#allocation4 + $0x8]] (!%p1040_p1)  ;;  %s1076_s13 = sld [smem:[#allocation4 + $0xa]] (!%p1040_p1) }
  0x30   :  { %v65_v3 = vadd.s32 (!%p1040_p1), 128, %v64_v1  ;;  %v66_v4 = vand.u32 (!%p1040_p1), 15, %v64_v1  ;;  %v68_v5 = vshra.s32 (!%p1040_p1), %v64_v1, 4  ;;  %s1049_s14 = sld [smem:[#allocation4 + $0x5]] (!%p1040_p1)  ;;  %s1077_s15 = sld [smem:[#allocation4 + $0xb]] (!%p1040_p1) }
  0x32   :  { %v67_v6 = vand.u32 (!%p1040_p1), 15, %v65_v3  ;;  %v69_v7 = vshra.s32 (!%p1040_p1), %v65_v3, 4  ;;  %v70_v8 = vcvt.s32.f32 (!%p1040_p1), %v66_v4  ;;  %v76_v12 = vcvt.s32.f32 (!%p1040_p1), %v68_v5 }
  0x33   :  { %v99_v15 = vstv (!%p1040_p1), %s1256_s2  ;;  %v438_v16 = vstv (!%p1040_p1), %s1258_s8  ;;  %v102_v17 = vstv (!%p1040_p1), %s1262_s9 }
  0x34   :  { %v71_v9 = vcvt.s32.f32 %v67_v6  ;;  %v77_v10 = vcvt.s32.f32 %v69_v7  ;;  %v72_v11 = vmul.f32 0.13333334, %v70_v8  ;;  %v441_v18 = vstv %s1264_s10  ;;  %s1047_s10 = sld [smem:[#allocation4 + $0x3]] }
  0x35   :  { %v78_v20 = vmul.f32 0.13333334, %v76_v12  ;;  %v107_v30 = vstv %s1266_s11  ;;  %v446_v31 = vstv %s1268_s12  ;;  %s1048_s11 = sld [smem:[#allocation4 + $0x4]]  ;;  %s1075_s12 = sld [smem:[#allocation4 + $0x9]] }
  0x36   :  { %v73_v13 = vmul.f32 0.13333334, %v71_v9  ;;  %v79_v14 = vmul.f32 0.13333334, %v77_v10  ;;  %v1274_v19 = vadd.f32 -1.0, %v72_v11 }
  0x37   :  { %v1280_v23 = vadd.f32 -1.0, %v78_v20 }
  0x38   :  { %v1276_v21 = vadd.f32 -1.0, %v73_v13  ;;  %v1278_v22 = vadd.f32 -1.0, %v79_v14  ;;  %v100_v24 = vmul.f32 %v1274_v19, %v99_v15  ;;  %v439_v25 = vmul.f32 %v1274_v19, %v438_v16 }
  0x39   :  { %v103_v32 = vmul.f32 %v1280_v23, %v102_v17  ;;  %v442_v33 = vmul.f32 %v1280_v23, %v441_v18 }
  0x3a   :  { %v101_v26 = vmul.f32 %v1276_v21, %v99_v15  ;;  %v104_v27 = vmul.f32 %v1278_v22, %v102_v17  ;;  %v440_v28 = vmul.f32 %v1276_v21, %v438_v16  ;;  %v443_v29 = vmul.f32 %v1278_v22, %v441_v18 }
  0x3b   :  { %v105_v36 = vadd.f32 %v103_v32, %v100_v24  ;;  %v444_v37 = vadd.f32 %v442_v33, %v439_v25  ;;  %v83_v18 = vshrl.u32 %v63_v0, 7 }
  0x3c   :  { %v106_v34 = vadd.f32 %v104_v27, %v101_v26  ;;  %v445_v35 = vadd.f32 %v443_v29, %v440_v28 }
  0x3d   :  { %v108_v40 = vadd.f32 %v107_v30, %v105_v36  ;;  %v447_v41 = vadd.f32 %v446_v31, %v444_v37  ;;  %v84_v33 = vadd.s32 8, %v83_v18 }
  0x3e   :  { %v109_v38 = vadd.f32 %v107_v30, %v106_v34  ;;  %v448_v39 = vadd.f32 %v446_v31, %v445_v35 }
  0x3f   :  { %v121_v44 = vadd.f32 1.0, %v108_v40  ;;  %v460_v45 = vadd.f32 1.0, %v447_v41 }
  0x40   :  { %v122_v42 = vadd.f32 1.0, %v109_v38  ;;  %v461_v43 = vadd.f32 1.0, %v448_v39 }
  0x41   :  { %v123_v48 = vand.u32 2147483647, %v121_v44  ;;  %v462_v49 = vand.u32 2147483647, %v460_v45  ;;  %v132_v6 = vand.u32 2147483648, %v121_v44  ;;  %v471_v7 = vand.u32 2147483648, %v460_v45 }
  0x42   :  { %v134_v46 = vand.u32 2147483647, %v122_v42  ;;  %v473_v47 = vand.u32 2147483647, %v461_v43  ;;  %v143_v1 = vand.u32 2147483648, %v122_v42  ;;  %v482_v3 = vand.u32 2147483648, %v461_v43 }
  0x43   :  { %v125_v52 = vmul.f32 0.5, %v123_v48  ;;  %v464_v53 = vmul.f32 0.5, %v462_v49  ;;  %v1293_v43 = vcvt.s32.f32 %v83_v18  ;;  %v1295_v44 = vcvt.s32.f32 %v84_v33 }
  0x44   :  { %v136_v50 = vmul.f32 0.5, %v134_v46  ;;  %v475_v51 = vmul.f32 0.5, %v473_v47 }
  0x45   :  { %v126_v56 = vfloor.f32 %v125_v52  ;;  %v465_v57 = vfloor.f32 %v464_v53 }
  0x46   :  { %v137_v54 = vfloor.f32 %v136_v50  ;;  %v476_v55 = vfloor.f32 %v475_v51 }
  0x47   :  { %v127_v60 = vmul.f32 2.0, %v126_v56  ;;  %v466_v61 = vmul.f32 2.0, %v465_v57  ;;  %v233_v56 = vld [vmem:[%s1554_s3] sm:$0xff]  ;;  %v1090_v57 = vld [vmem:[%s1554_s3 + $0x30] sm:$0xff] }
  0x48   :  { %v138_v58 = vmul.f32 2.0, %v137_v54  ;;  %v477_v59 = vmul.f32 2.0, %v476_v55  ;;  %v1213_v55 = vmov 1.0|1.0  }
  0x49   :  { %v128_v4 = vsub.f32 %v123_v48, %v127_v60  ;;  %v467_v5 = vsub.f32 %v462_v49, %v466_v61  ;;  %v235_v60 = vld [vmem:[%s1554_s3 + $0x10] sm:$0xff]  ;;  %v1092_v61 = vld [vmem:[%s1554_s3 + $0x40] sm:$0xff] }
  0x4a   :  { %v139_v62 = vsub.f32 %v134_v46, %v138_v58  ;;  %v478_v63 = vsub.f32 %v473_v47, %v477_v59  ;;  %v234_v58 = vld [vmem:[%s1554_s3 + $0x8] sm:$0xff]  ;;  %v1091_v59 = vld [vmem:[%s1554_s3 + $0x38] sm:$0xff] }
  0x4b   :  { %vm129_vm2 = vcmp.eq.f32.partialorder %v128_v4, 2.0  ;;  %vm468_vm3 = vcmp.eq.f32.partialorder %v467_v5, 2.0 }
  0x4c   :  { %vm140_vm0 = vcmp.eq.f32.partialorder %v139_v62, 2.0  ;;  %vm479_vm1 = vcmp.eq.f32.partialorder %v478_v63, 2.0  ;;  %v130_v12 = vsel %vm129_vm2, 0.0, %v128_v4  ;;  %v469_v13 = vsel %vm468_vm3, 0.0, %v467_v5  ;;  %v238_v4 = vld [vmem:[%s1554_s3 + $0x28] sm:$0xff]  ;;  %v1095_v5 = vld [vmem:[%s1554_s3 + $0x58] sm:$0xff] }
  0x4d   :  { %v141_v8 = vsel %vm140_vm0, 0.0, %v139_v62  ;;  %v480_v9 = vsel %vm479_vm1, 0.0, %v478_v63  ;;  %v131_v14 = vand.u32 2147483647, %v130_v12  ;;  %v470_v15 = vand.u32 2147483647, %v469_v13 }
  0x4e   :  { %v142_v10 = vand.u32 2147483647, %v141_v8  ;;  %v481_v11 = vand.u32 2147483647, %v480_v9  ;;  %v236_v62 = vld [vmem:[%s1554_s3 + $0x18] sm:$0xff]  ;;  %v1093_v63 = vld [vmem:[%s1554_s3 + $0x48] sm:$0xff]  ;;  %v449_v8 = vstv %s1075_s12  ;;  %v452_v9 = vstv %s1076_s13 }
  0x4f   :  { %v133_v20 = vor.u32 %v132_v6, %v131_v14  ;;  %v472_v24 = vor.u32 %v471_v7, %v470_v15  ;;  %v110_v6 = vstv %s1047_s10  ;;  %v113_v7 = vstv %s1048_s11 }
  0x50   :  { %v144_v16 = vor.u32 %v143_v1, %v142_v10  ;;  %v483_v17 = vor.u32 %v482_v3, %v481_v11  ;;  %v237_v1 = vld [vmem:[%s1554_s3 + $0x20] sm:$0xff]  ;;  %v1094_v3 = vld [vmem:[%s1554_s3 + $0x50] sm:$0xff]  ;;  %v111_v10 = vmul.f32 %v1274_v19, %v110_v6  ;;  %v114_v11 = vmul.f32 %v1280_v23, %v113_v7 }
  0x51   :  { %vm145_vm9 = vcmp.ne.f32.partialorder %v133_v20, 0.0  ;;  %vm147_vm10 = vcmp.lt.f32.partialorder %v133_v20, 0.0  ;;  %v151_v28 = vadd.f32 2.0, %v133_v20  ;;  %vm484_vm12 = vcmp.ne.f32.partialorder %v472_v24, 0.0 }
  0x52   :  { %vm146_vm4 = vcmp.ne.f32.partialorder %v144_v16, 0.0  ;;  %vm148_vm5 = vcmp.lt.f32.partialorder %v144_v16, 0.0  ;;  %v152_v25 = vadd.f32 2.0, %v144_v16  ;;  %vm485_vm6 = vcmp.ne.f32.partialorder %v483_v17, 0.0  ;;  %vm149_vm14 = vmand %vm147_vm10, %vm145_vm9 }
  0x53   :  { %vm150_vm7 = vmand %vm148_vm5, %vm146_vm4  ;;  %vm487_vm8 = vcmp.lt.f32.partialorder %v483_v17, 0.0  ;;  %v491_v26 = vadd.f32 2.0, %v483_v17  ;;  %vm486_vm13 = vcmp.lt.f32.partialorder %v472_v24, 0.0  ;;  %v490_v0 = vadd.f32 2.0, %v472_v24 }
  0x54   :  { %v154_v27 = vsel %vm150_vm7, %v152_v25, %v144_v16  ;;  %vm489_vm11 = vmand %vm487_vm8, %vm485_vm6  ;;  %v153_v32 = vsel %vm149_vm14, %v151_v28, %v133_v20  ;;  %v450_v12 = vmul.f32 %v1274_v19, %v449_v8  ;;  %v453_v13 = vmul.f32 %v1280_v23, %v452_v9 }
  0x55   :  { %v1051_v29 = vadd.f32 -1.0, %v154_v27  ;;  %v493_v30 = vsel %vm489_vm11, %v491_v26, %v483_v17  ;;  %vm488_vm15 = vmand %vm486_vm13, %vm484_vm12  ;;  %v1050_v35 = vadd.f32 -1.0, %v153_v32  ;;  %vm239_vm12 = vcmask 130048  }
  0x56   :  { %v1079_v31 = vadd.f32 -1.0, %v493_v30  ;;  %v492_v36 = vsel %vm488_vm15, %v490_v0, %v472_v24  ;;  %v112_v14 = vmul.f32 %v1276_v21, %v110_v6  ;;  %v115_v15 = vmul.f32 %v1278_v22, %v113_v7 }
  0x57   :  { %v194_v34 = vadd.f32 1.0, %v1051_v29  ;;  %v1078_v38 = vadd.f32 -1.0, %v492_v36  ;;  %v193_v40 = vadd.f32 1.0, %v1050_v35  ;;  %v451_v16 = vmul.f32 %v1276_v21, %v449_v8 }
  0x58   :  { %v533_v37 = vadd.f32 1.0, %v1079_v31  ;;  %v454_v17 = vmul.f32 %v1278_v22, %v452_v9  ;;  %v116_v18 = vadd.f32 %v114_v11, %v111_v10  ;;  %v118_v20 = vstv %s1049_s14 }
  0x59   :  { %v196_v39 = vmul.f32 0.5, %v194_v34  ;;  %v532_v42 = vadd.f32 1.0, %v1078_v38  ;;  %v195_v46 = vmul.f32 0.5, %v193_v40  ;;  %v455_v24 = vadd.f32 %v453_v13, %v450_v12 }
  0x5a   :  { %v535_v41 = vmul.f32 0.5, %v533_v37  ;;  %v457_v25 = vstv %s1077_s15  ;;  %v117_v26 = vadd.f32 %v115_v15, %v112_v14  ;;  %v456_v27 = vadd.f32 %v454_v17, %v451_v16 }
  0x5b   :  { %v198_v45 = vmul.f32 15.0, %v196_v39  ;;  %v534_v48 = vmul.f32 0.5, %v532_v42  ;;  %v197_v50 = vmul.f32 15.0, %v195_v46  ;;  %v119_v28 = vadd.f32 %v118_v20, %v116_v18 }
  0x5c   :  { %v537_v47 = vmul.f32 15.0, %v535_v41  ;;  %v458_v29 = vadd.f32 %v457_v25, %v455_v24  ;;  %v120_v30 = vadd.f32 %v118_v20, %v117_v26  ;;  %v459_v19 = vadd.f32 %v457_v25, %v456_v27 }
  0x5d   :  { %v1157_v49 = vround.rtne.f32 %v198_v45  ;;  %v536_v52 = vmul.f32 15.0, %v534_v48  ;;  %v1156_v53 = vround.rtne.f32 %v197_v50  ;;  %v157_v0 = vadd.f32 1.0, %v119_v28 }
  0x5e   :  { %v1161_v51 = vround.rtne.f32 %v537_v47  ;;  %v496_v23 = vadd.f32 1.0, %v458_v29  ;;  %v158_v31 = vadd.f32 1.0, %v120_v30  ;;  %v497_v32 = vadd.f32 1.0, %v459_v19 }
  0x5f   :  { %vm210_vm0 = vcmp.eq.f32.partialorder %v1293_v43, %v1157_v49  ;;  %vm212_vm1 = vcmp.eq.f32.partialorder %v1295_v44, %v1157_v49  ;;  %v1160_v54 = vround.rtne.f32 %v536_v52  ;;  %vm209_vm6 = vcmp.eq.f32.partialorder %v1293_v43, %v1156_v53 }
  0x60   :  { %vm1148_vm2 = vmpackc.low %vm212_vm1, %vm210_vm0  ;;  %vm549_vm3 = vcmp.eq.f32.partialorder %v1293_v43, %v1161_v51  ;;  %vm551_vm4 = vcmp.eq.f32.partialorder %v1295_v44, %v1161_v51  ;;  %vm211_vm7 = vcmp.eq.f32.partialorder %v1295_v44, %v1156_v53  ;;  %v159_v33 = vand.u32 2147483647, %v157_v0 }
  0x61   :  { %1149 = vmatprep.subr.msk.bf16.mxu0 %vm1148_vm2, %v1213_v55  ;;  %vm1152_vm5 = vmpackc.low %vm551_vm4, %vm549_vm3  ;;  %vm548_vm9 = vcmp.eq.f32.partialorder %v1293_v43, %v1160_v54  ;;  %vm550_vm10 = vcmp.eq.f32.partialorder %v1295_v44, %v1160_v54  ;;  %v498_v34 = vand.u32 2147483647, %v496_v23  ;;  %v170_v35 = vand.u32 2147483647, %v158_v31 }
  0x62   :  { %1153 = vmatprep.subr.msk.bf16.mxu1 %vm1152_vm5, %v1213_v55  ;;  %vm1150_vm8 = vmpackc.low %vm211_vm7, %vm209_vm6  ;;  %v509_v21 = vand.u32 2147483647, %v497_v32  ;;  %v161_v36 = vmul.f32 0.5, %v159_v33 }
  0x63   :  { %1151 = vmatpush1.bf16.msk.msra.mxu0 %vm1150_vm8, %v1213_v55  ;;  %vm1154_vm11 = vmpackc.low %vm550_vm10, %vm548_vm9  ;;  %v500_v22 = vmul.f32 0.5, %v498_v34  ;;  %v172_v37 = vmul.f32 0.5, %v170_v35 }
  0x64   :  { %1155 = vmatpush1.bf16.msk.msra.mxu1 %vm1154_vm11, %v1213_v55  ;;  %v511_v38 = vmul.f32 0.5, %v509_v21  ;;  %v162_v39 = vfloor.f32 %v161_v36 }
  0x65   :  { %v501_v40 = vfloor.f32 %v500_v22  ;;  %v173_v41 = vfloor.f32 %v172_v37 }
  0x66   :  { %1066 = vmatmul.mubr.msk.f32.vlgmr.msra.gmra.mrb[0].mxu0 %vm239_vm12, %v233_v56  ;;  %v512_v42 = vfloor.f32 %v511_v38  ;;  %v163_v45 = vmul.f32 2.0, %v162_v39 }
  0x67   :  { %1100 = vmatmul.mubr.msk.f32.vlgmr.msra.gmra.mrb[0].mxu1 %vm239_vm12, %v1090_v57  ;;  %328 = vmatprep.mubr.f32.mxu0 %v1212_v2  ;;  %v502_v46 = vmul.f32 2.0, %v501_v40  ;;  %v174_v47 = vmul.f32 2.0, %v173_v41  ;;  %v168_v57 = vand.u32 2147483648, %v157_v0 }
  0x68   :  { %667 = vmatprep.mubr.f32.mxu1 %v1212_v2  ;;  %v513_v48 = vmul.f32 2.0, %v512_v42  ;;  %v164_v49 = vsub.f32 %v159_v33, %v163_v45 }
  0x69   :  { %v503_v50 = vsub.f32 %v498_v34, %v502_v46  ;;  %v175_v51 = vsub.f32 %v170_v35, %v174_v47 }
  0x6a   :  { %1067 = vmatmul.mubr.msk.f32.gmra.mrb[2].mxu0 %vm239_vm12, %v234_v58  ;;  %v514_v52 = vsub.f32 %v509_v21, %v513_v48  ;;  %vm165_vm13 = vcmp.eq.f32.partialorder %v164_v49, 2.0 }
  0x6b   :  { %1101 = vmatmul.mubr.msk.f32.gmra.mrb[2].mxu1 %vm239_vm12, %v1091_v59  ;;  %334 = vmatprep.mubr.f32.mxu0 %v1212_v2  ;;  %vm504_vm14 = vcmp.eq.f32.partialorder %v503_v50, 2.0  ;;  %vm176_vm15 = vcmp.eq.f32.partialorder %v175_v51, 2.0  ;;  %v166_v53 = vsel %vm165_vm13, 0.0, %v164_v49 }
  0x6c   :  { %673 = vmatprep.mubr.f32.mxu1 %v1212_v2  ;;  %vm515_vm0 = vcmp.eq.f32.partialorder %v514_v52, 2.0  ;;  %v505_v54 = vsel %vm504_vm14, 0.0, %v503_v50  ;;  %v177_v55 = vsel %vm176_vm15, 0.0, %v175_v51  ;;  %v167_v56 = vand.u32 2147483647, %v166_v53 }
  0x6d   :  { %v516_v58 = vsel %vm515_vm0, 0.0, %v514_v52  ;;  %v506_v59 = vand.u32 2147483647, %v505_v54 }
  0x6e   :  { %1068 = vmatmul.mubr.msk.f32.gmra.mrb[4].mxu0 %vm239_vm12, %v235_v60  ;;  %v507_v60 = vand.u32 2147483648, %v496_v23 }
  0x6f   :  { %1102 = vmatmul.mubr.msk.f32.gmra.mrb[4].mxu1 %vm239_vm12, %v1092_v61  ;;  %340 = vmatprep.mubr.f32.mxu0 %v1212_v2  ;;  %v178_v61 = vand.u32 2147483647, %v177_v55 }
  0x70   :  { %679 = vmatprep.mubr.f32.mxu1 %v1212_v2 }
  0x72   :  { %1069 = vmatmul.mubr.msk.f32.gmra.mrb[6].mxu0 %vm239_vm12, %v236_v62  ;;  %v179_v62 = vand.u32 2147483648, %v158_v31 }
  0x73   :  { %1103 = vmatmul.mubr.msk.f32.gmra.mrb[6].mxu1 %vm239_vm12, %v1093_v63  ;;  %346 = vmatprep.mubr.f32.mxu0 %v1212_v2  ;;  %v517_v63 = vand.u32 2147483647, %v516_v58 }
  0x74   :  { %685 = vmatprep.mubr.f32.mxu1 %v1212_v2 }
  0x76   :  { %1070 = vmatmul.mubr.msk.f32.gmra.mrb[8].mxu0 %vm239_vm12, %v237_v1  ;;  %v518_v1 = vand.u32 2147483648, %v497_v32 }
  0x77   :  { %1104 = vmatmul.mubr.msk.f32.gmra.mrb[8].mxu1 %vm239_vm12, %v1094_v3  ;;  %352 = vmatprep.mubr.f32.mxu0 %v1212_v2  ;;  %v169_v3 = vor.u32 %v168_v57, %v167_v56 }
  0x78   :  { %691 = vmatprep.mubr.f32.mxu1 %v1212_v2  ;;  %v519_v6 = vor.u32 %v518_v1, %v517_v63 }
  0x79   :  { %vm181_vm1 = vcmp.ne.f32.partialorder %v169_v3, 0.0  ;;  %vm183_vm2 = vcmp.lt.f32.partialorder %v169_v3, 0.0  ;;  %v187_v7 = vadd.f32 2.0, %v169_v3 }
  0x7a   :  { %1071 = vmatmul.mubr.msk.f32.gmra.mrb[10].mxu0 %vm239_vm12, %v238_v4  ;;  %v508_v4 = vor.u32 %v507_v60, %v506_v59  ;;  %vm185_vm7 = vmand %vm183_vm2, %vm181_vm1  ;;  %vm521_vm8 = vcmp.ne.f32.partialorder %v519_v6, 0.0  ;;  %vm523_vm9 = vcmp.lt.f32.partialorder %v519_v6, 0.0  ;;  %v527_v10 = vadd.f32 2.0, %v519_v6 }
  0x7b   :  { %1105 = vmatmul.mubr.msk.f32.gmra.mrb[10].mxu1 %vm239_vm12, %v1095_v5  ;;  %v180_v5 = vor.u32 %v179_v62, %v178_v61  ;;  %vm525_vm12 = vmand %vm523_vm9, %vm521_vm8  ;;  %v189_v11 = vsel %vm185_vm7, %v187_v7, %v169_v3 }
  0x7c   :  { %vm520_vm3 = vcmp.ne.f32.partialorder %v508_v4, 0.0  ;;  %vm522_vm4 = vcmp.lt.f32.partialorder %v508_v4, 0.0  ;;  %v526_v8 = vadd.f32 2.0, %v508_v4  ;;  %v529_v14 = vsel %vm525_vm12, %v527_v10, %v519_v6 }
  0x7d   :  { %vm182_vm5 = vcmp.ne.f32.partialorder %v180_v5, 0.0  ;;  %vm184_vm6 = vcmp.lt.f32.partialorder %v180_v5, 0.0  ;;  %vm524_vm10 = vmand %vm522_vm4, %vm520_vm3  ;;  %v188_v9 = vadd.f32 2.0, %v180_v5  ;;  %v1052_v15 = vadd.f32 -1.0, %v189_v11 }
  0x7e   :  { %vm186_vm11 = vmand %vm184_vm6, %vm182_vm5  ;;  %v528_v12 = vsel %vm524_vm10, %v526_v8, %v508_v4  ;;  %v1081_v18 = vadd.f32 -1.0, %v529_v14  ;;  %vm413_vm5 = vcmask 1040384   ;;  %vm416_vm6 = vcmask 1041408  }
  0x7f   :  { %v190_v13 = vsel %vm186_vm11, %v188_v9, %v180_v5  ;;  %v1080_v16 = vadd.f32 -1.0, %v528_v12  ;;  %v201_v20 = vadd.f32 1.0, %v1052_v15 }
  0x80   :  { %v1053_v17 = vadd.f32 -1.0, %v190_v13  ;;  %v541_v26 = vadd.f32 1.0, %v1081_v18 }
  0x81   :  { %v540_v24 = vadd.f32 1.0, %v1080_v16  ;;  %v203_v27 = vmul.f32 0.5, %v201_v20 }
  0x82   :  { %v202_v25 = vadd.f32 1.0, %v1053_v17  ;;  %v543_v30 = vmul.f32 0.5, %v541_v26 }
  0x83   :  { %v542_v28 = vmul.f32 0.5, %v540_v24  ;;  %v205_v19 = vmul.f32 15.0, %v203_v27 }
  0x84   :  { %v204_v29 = vmul.f32 0.5, %v202_v25  ;;  %v545_v31 = vmul.f32 15.0, %v543_v30 }
  0x85   :  { %v544_v0 = vmul.f32 15.0, %v542_v28  ;;  %v1158_v32 = vround.rtne.f32 %v205_v19 }
  0x86   :  { %v206_v23 = vmul.f32 15.0, %v204_v29  ;;  %v1163_v35 = vround.rtne.f32 %v545_v31 }
  0x87   :  { %v1162_v33 = vround.rtne.f32 %v544_v0  ;;  %vm221_vm13 = vcmp.eq.f32.partialorder %v1293_v43, %v1158_v32  ;;  %vm223_vm14 = vcmp.eq.f32.partialorder %v1295_v44, %v1158_v32 }
  0x88   :  { %v1159_v34 = vround.rtne.f32 %v206_v23  ;;  %vm561_vm3 = vcmp.eq.f32.partialorder %v1293_v43, %v1163_v35  ;;  %vm563_vm4 = vcmp.eq.f32.partialorder %v1295_v44, %v1163_v35  ;;  %v1380_v37 = vsel %vm221_vm13, 1.0, %v1212_v2 }
  0x89   :  { %vm560_vm15 = vcmp.eq.f32.partialorder %v1293_v43, %v1162_v33  ;;  %vm562_vm1 = vcmp.eq.f32.partialorder %v1295_v44, %v1162_v33  ;;  %v1383_v39 = vsel %vm223_vm14, 1.0, %v1212_v2  ;;  %v1401_v46 = vsel %vm563_vm4, 1.0, %v1212_v2 }
  0x8a   :  { %vm222_vm0 = vcmp.eq.f32.partialorder %v1293_v43, %v1159_v34  ;;  %vm224_vm2 = vcmp.eq.f32.partialorder %v1295_v44, %v1159_v34  ;;  %v1386_v40 = vsel %vm560_vm15, 1.0, %v1212_v2  ;;  %v1392_v42 = vsel %vm562_vm1, 1.0, %v1212_v2 }
  0x8b   :  { %v1389_v41 = vsel %vm222_vm0, 1.0, %v1212_v2  ;;  %v1395_v43 = vsel %vm224_vm2, 1.0, %v1212_v2  ;;  %v1398_v44 = vsel %vm561_vm3, 1.0, %v1212_v2 }
 0x139   :  { %v324_v21 = vpop.f32.mrb[0].mxu0 }
 0x13a   :  { %v663_v36 = vpop.f32.mrb[0].mxu1  ;;  %v326_v22 = vpop.f32.mrb[1].mxu0  ;;  %v359_v47 = vmul.f32 %v1380_v37, %v324_v21 }
 0x13b   :  { %v665_v38 = vpop.f32.mrb[1].mxu1  ;;  %v698_v51 = vmul.f32 %v1386_v40, %v663_v36  ;;  %v360_v52 = vmul.f32 %v1389_v41, %v326_v22 }
 0x13c   :  { %v699_v56 = vmul.f32 %v1398_v44, %v665_v38 }
 0x13d   :  { %v330_v45 = vpop.f32.mrb[2].mxu0 }
 0x13e   :  { %v361_v48 = vmul.f32 %v1383_v39, %v330_v45  ;;  %v669_v49 = vpop.f32.mrb[2].mxu1  ;;  %v332_v50 = vpop.f32.mrb[3].mxu0 }
 0x13f   :  { %v700_v53 = vmul.f32 %v1392_v42, %v669_v49  ;;  %v362_v54 = vmul.f32 %v1395_v43, %v332_v50  ;;  %v671_v55 = vpop.f32.mrb[3].mxu1 }
 0x140   :  { %v363_v57 = vadd.f32 %v361_v48, %v359_v47  ;;  %v701_v2 = vmul.f32 %v1401_v46, %v671_v55 }
 0x141   :  { %v702_v58 = vadd.f32 %v700_v53, %v698_v51  ;;  %v370_v59 = vadd.f32 %v362_v54, %v360_v52  ;;  %v336_v60 = vpop.f32.mrb[4].mxu0 }
 0x142   :  { %v364_v61 = vrot.slane %v363_v57, 4  ;;  %v709_v62 = vadd.f32 %v701_v2, %v699_v56  ;;  %v675_v63 = vpop.f32.mrb[4].mxu1  ;;  %v338_v1 = vpop.f32.mrb[5].mxu0  ;;  %v377_v8 = vmul.f32 %v1380_v37, %v336_v60 }
 0x143   :  { %v703_v3 = vrot.slane %v702_v58, 4  ;;  %v371_v4 = vrot.slane %v370_v59, 4  ;;  %v677_v5 = vpop.f32.mrb[5].mxu1  ;;  %v716_v11 = vmul.f32 %v1386_v40, %v675_v63  ;;  %v378_v12 = vmul.f32 %v1389_v41, %v338_v1 }
 0x144   :  { %v365_v6 = vadd.f32 %v364_v61, %v363_v57  ;;  %v710_v7 = vrot.slane %v709_v62, 4  ;;  %v717_v16 = vmul.f32 %v1398_v44, %v677_v5 }
 0x145   :  { %v704_v9 = vadd.f32 %v703_v3, %v702_v58  ;;  %v372_v10 = vadd.f32 %v371_v4, %v370_v59  ;;  %v342_v13 = vpop.f32.mrb[6].mxu0 }
 0x146   :  { %v366_v14 = vrot.slane %v365_v6, 2  ;;  %v711_v15 = vadd.f32 %v710_v7, %v709_v62  ;;  %v379_v17 = vmul.f32 %v1383_v39, %v342_v13  ;;  %v681_v18 = vpop.f32.mrb[6].mxu1  ;;  %v344_v20 = vpop.f32.mrb[7].mxu0 }
 0x147   :  { %v705_v24 = vrot.slane %v704_v9, 2  ;;  %v373_v25 = vrot.slane %v372_v10, 2  ;;  %v718_v26 = vmul.f32 %v1392_v42, %v681_v18  ;;  %v380_v27 = vmul.f32 %v1395_v43, %v344_v20  ;;  %v683_v28 = vpop.f32.mrb[7].mxu1 }
 0x148   :  { %v367_v29 = vadd.f32 %v366_v14, %v365_v6  ;;  %v712_v30 = vrot.slane %v711_v15, 2  ;;  %v381_v19 = vadd.f32 %v379_v17, %v377_v8  ;;  %v719_v0 = vmul.f32 %v1401_v46, %v683_v28 }
 0x149   :  { %v706_v23 = vadd.f32 %v705_v24, %v704_v9  ;;  %v374_v31 = vadd.f32 %v373_v25, %v372_v10  ;;  %v720_v32 = vadd.f32 %v718_v26, %v716_v11  ;;  %v388_v33 = vadd.f32 %v380_v27, %v378_v12  ;;  %v348_v34 = vpop.f32.mrb[8].mxu0 }
 0x14a   :  { %v368_v35 = vrot.slane %v367_v29, 1  ;;  %v713_v21 = vadd.f32 %v712_v30, %v711_v15  ;;  %v382_v36 = vrot.slane %v381_v19, 4  ;;  %v727_v22 = vadd.f32 %v719_v0, %v717_v16  ;;  %v687_v38 = vpop.f32.mrb[8].mxu1  ;;  %v350_v45 = vpop.f32.mrb[9].mxu0 }
 0x14b   :  { %v707_v47 = vrot.slane %v706_v23, 1  ;;  %v375_v48 = vrot.slane %v374_v31, 1  ;;  %v721_v49 = vrot.slane %v720_v32, 4  ;;  %v389_v50 = vrot.slane %v388_v33, 4  ;;  %v689_v51 = vpop.f32.mrb[9].mxu1 }
 0x14c   :  { %v369_v52 = vadd.f32 %v368_v35, %v367_v29  ;;  %v714_v53 = vrot.slane %v713_v21, 1  ;;  %v383_v54 = vadd.f32 %v382_v36, %v381_v19  ;;  %v728_v55 = vrot.slane %v727_v22, 4 }
 0x14d   :  { %v708_v56 = vadd.f32 %v707_v47, %v706_v23  ;;  %v376_v57 = vadd.f32 %v375_v48, %v374_v31  ;;  %v722_v2 = vadd.f32 %v721_v49, %v720_v32  ;;  %v390_v58 = vadd.f32 %v389_v50, %v388_v33  ;;  %v354_v59 = vpop.f32.mrb[10].mxu0 }
 0x14e   :  { %v715_v60 = vadd.f32 %v714_v53, %v713_v21  ;;  %v384_v61 = vrot.slane %v383_v54, 2  ;;  %v729_v62 = vadd.f32 %v728_v55, %v727_v22  ;;  %v395_v63 = vmul.f32 %v1380_v37, %v348_v34  ;;  %v693_v1 = vpop.f32.mrb[10].mxu1  ;;  %v356_v3 = vpop.f32.mrb[11].mxu0 }
 0x14f   :  { %v723_v4 = vrot.slane %v722_v2, 2  ;;  %v391_v5 = vrot.slane %v390_v58, 2  ;;  %v734_v6 = vmul.f32 %v1386_v40, %v687_v38  ;;  %v396_v7 = vmul.f32 %v1389_v41, %v350_v45  ;;  %v695_v8 = vpop.f32.mrb[11].mxu1 }
 0x150   :  { %v385_v9 = vadd.f32 %v384_v61, %v383_v54  ;;  %v730_v10 = vrot.slane %v729_v62, 2  ;;  %v735_v11 = vmul.f32 %v1398_v44, %v689_v51  ;;  %v397_v12 = vmul.f32 %v1383_v39, %v354_v59 }
 0x151   :  { %v724_v13 = vadd.f32 %v723_v4, %v722_v2  ;;  %v392_v14 = vadd.f32 %v391_v5, %v390_v58  ;;  %v736_v15 = vmul.f32 %v1392_v42, %v693_v1  ;;  %v398_v37 = vmul.f32 %v1395_v43, %v356_v3 }
 0x152   :  { %v386_v16 = vrot.slane %v385_v9, 1  ;;  %v731_v17 = vadd.f32 %v730_v10, %v729_v62  ;;  %v399_v18 = vadd.f32 %v397_v12, %v395_v63  ;;  %v737_v40 = vmul.f32 %v1401_v46, %v695_v8 }
 0x153   :  { %v725_v20 = vrot.slane %v724_v13, 1  ;;  %v393_v41 = vrot.slane %v392_v14, 1  ;;  %v738_v24 = vadd.f32 %v736_v15, %v734_v6  ;;  %v406_v25 = vadd.f32 %v398_v37, %v396_v7 }
 0x154   :  { %v387_v26 = vadd.f32 %v386_v16, %v385_v9  ;;  %v732_v27 = vrot.slane %v731_v17, 1  ;;  %v400_v44 = vrot.slane %v399_v18, 4  ;;  %v745_v28 = vadd.f32 %v737_v40, %v735_v11 }
 0x155   :  { %v726_v39 = vadd.f32 %v725_v20, %v724_v13  ;;  %v394_v29 = vadd.f32 %v393_v41, %v392_v14  ;;  %v739_v30 = vrot.slane %v738_v24, 4  ;;  %v407_v19 = vrot.slane %v406_v25, 4 }
 0x156   :  { %v414_v42 = vsel %vm413_vm5, %v369_v52, %v387_v26  ;;  %v733_v43 = vadd.f32 %v732_v27, %v731_v17  ;;  %v401_v0 = vadd.f32 %v400_v44, %v399_v18  ;;  %v746_v23 = vrot.slane %v745_v28, 4 }
 0x157   :  { %v752_v31 = vsel %vm413_vm5, %v708_v56, %v726_v39  ;;  %v415_v46 = vsel %vm413_vm5, %v376_v57, %v394_v29  ;;  %v740_v32 = vadd.f32 %v739_v30, %v738_v24  ;;  %v408_v33 = vadd.f32 %v407_v19, %v406_v25 }
 0x158   :  { %v753_v34 = vsel %vm413_vm5, %v715_v60, %v733_v43  ;;  %v402_v35 = vrot.slane %v401_v0, 2  ;;  %v747_v21 = vadd.f32 %v746_v23, %v745_v28 }
 0x159   :  { %v741_v36 = vrot.slane %v740_v32, 2  ;;  %v409_v22 = vrot.slane %v408_v33, 2 }
 0x15a   :  { %v403_v38 = vadd.f32 %v402_v35, %v401_v0  ;;  %v748_v45 = vrot.slane %v747_v21, 2 }
 0x15b   :  { %v742_v47 = vadd.f32 %v741_v36, %v740_v32  ;;  %v410_v48 = vadd.f32 %v409_v22, %v408_v33 }
 0x15c   :  { %v404_v49 = vrot.slane %v403_v38, 1  ;;  %v749_v50 = vadd.f32 %v748_v45, %v747_v21 }
 0x15d   :  { %v743_v51 = vrot.slane %v742_v47, 1  ;;  %v411_v52 = vrot.slane %v410_v48, 1 }
 0x15e   :  { %v405_v53 = vadd.f32 %v404_v49, %v403_v38  ;;  %v750_v54 = vrot.slane %v749_v50, 1 }
 0x15f   :  { %v744_v55 = vadd.f32 %v743_v51, %v742_v47  ;;  %v412_v56 = vadd.f32 %v411_v52, %v410_v48 }
 0x160   :  { %v417_v57 = vsel %vm416_vm6, %v414_v42, %v405_v53  ;;  %v751_v2 = vadd.f32 %v750_v54, %v749_v50 }
 0x161   :  { %v754_v58 = vsel %vm416_vm6, %v752_v31, %v744_v55  ;;  %v418_v59 = vsel %vm416_vm6, %v415_v46, %v412_v56 }
 0x162   :  { %v421_v60 = vcombine.low %v417_v57, %v418_v59  ;;  %v755_v61 = vsel %vm416_vm6, %v753_v34, %v751_v2 }
 0x163   :  { %v758_v62 = vcombine.low %v754_v58, %v755_v61 }
 0x164   :  { %423 = vst [vmem:[%s1556_s5] sm:$0x77] %v421_v60 }
 0x165   :  { %1106 = vst [vmem:[%s1556_s5 + $0x8] sm:$0x77] %v758_v62 }
 0x166 PF:  { %s762_s19 = sld [smem:[#allocation2]] }
 0x16c   :  { %p1107_p2 = scmp.ne.s32.totalorder %s762_s19, 0 }
 0x16d   :  { %v767_v63 = vld [vmem:[%s1555_s4] sm:$0x77] (!%p1107_p2)  ;;  %v768_v1 = vld [vmem:[%s1555_s4 + $0x8] sm:$0x77] (!%p1107_p2) }
 0x16e   :  { %766 = sbr.rel (%p1107_p2) target bundleno = 373 (0x175), region = 41  ;;  %769 = vst [vmem:[%s1556_s5] sm:$0x77] (!%p1107_p2), %v767_v63  ;;  %770 = vst [vmem:[%s1556_s5 + $0x8] sm:$0x77] (!%p1107_p2), %v768_v1 }
 0x175 PF:  { %p1108_p3 = scmp.eq.s32.totalorder %s1253_s7, 0 }
 0x176   :  { %s775_s0 = sld [smem:[#allocation6]] (!%p1108_p3)  ;;  %s1109_s27 = sld [smem:[#allocation6 + $0x1]] (!%p1108_p3)  ;;  %v798_v3 = vld [vmem:[%s1556_s5] sm:$0x77] (!%p1108_p3)  ;;  %v856_v4 = vlaneseq (!%p1108_p3)  ;;  %v1139_v8 = vld [vmem:[%s1556_s5 + $0x8] sm:$0x77] (!%p1108_p3) }
 0x177   :  { %773 = sbr.rel (%p1108_p3) target bundleno = 418 (0x1a2), region = 45  ;;  %s1110_s4 = sld [smem:[#allocation6 + $0x2]] (!%p1108_p3)  ;;  %v799_v5 = vmul.f32 (!%p1108_p3), 2.0, %v798_v3  ;;  %v931_v12 = vmul.f32 (!%p1108_p3), 2.0, %v1139_v8  ;;  %vm888_vm7 = vcmask (!%p1108_p3), 1040384   ;;  %vm891_vm8 = vcmask (!%p1108_p3), 1041408  }
 0x178   :  { %s1453_s30 = sld [smem:[#allocation6 + $0x3]] (!%p1108_p3)  ;;  %s1112_s6 = sld [smem:[#allocation6 + $0x4]] (!%p1108_p3)  ;;  %v857_v6 = vshrl.u32 (!%p1108_p3), %v856_v4, 7 }
 0x179   :  { %s1113_s2 = sld [smem:[#allocation6 + $0x5]] (!%p1108_p3)  ;;  %s1114_s8 = sld [smem:[#allocation6 + $0x6]] (!%p1108_p3)  ;;  %v1120_v7 = vadd.f32 (!%p1108_p3), -1.0, %v799_v5  ;;  %v1484_v28 = vadd.f32 (!%p1108_p3), -1.0, %v931_v12 }
 0x17a   :  { %s1455_s9 = sld [smem:[#allocation6 + $0x7]] (!%p1108_p3)  ;;  %s1457_s7 = sld [smem:[#allocation6 + $0x8]] (!%p1108_p3)  ;;  %v1466_v11 = vsub.s32 (!%p1108_p3), 0, %v857_v6  ;;  %v1472_v37 = vsub.s32 (!%p1108_p3), 4, %v857_v6 }
 0x17b   :  { %s1459_s10 = sld [smem:[#allocation6 + $0x9]] (!%p1108_p3)  ;;  %s1461_s11 = sld [smem:[#allocation6 + $0xa]] (!%p1108_p3) }
 0x17c   :  { %v801_v9 = vstv (!%p1108_p3), %s775_s0  ;;  %v803_v10 = vstv (!%p1108_p3), %s1109_s27  ;;  %s1468_s14 = sld [smem:[#allocation6 + $0xc]] (!%p1108_p3)  ;;  %s1470_s15 = sld [smem:[#allocation6 + $0xd]] (!%p1108_p3) }
 0x17d   :  { %v802_v13 = vmul.f32 (!%p1108_p3), %v1120_v7, %v801_v9  ;;  %v804_v14 = vmul.f32 (!%p1108_p3), %v1120_v7, %v803_v10  ;;  %v810_v15 = vstv (!%p1108_p3), %s1110_s4  ;;  %s1474_s3 = sld [smem:[#allocation6 + $0xe]] (!%p1108_p3)  ;;  %s1476_s16 = sld [smem:[#allocation6 + $0xb]] (!%p1108_p3) }
 0x17e   :  { %v811_v16 = vmul.f32 %v1120_v7, %v810_v15  ;;  %v817_v17 = vstv %s1453_s30  ;;  %v819_v18 = vstv %s1112_s6  ;;  %s1479_s17 = sld [smem:[#allocation6 + $0x10]]  ;;  %s1482_s18 = sld [smem:[#allocation6 + $0x11]] }
 0x17f   :  { %v821_v40 = vstv %s1113_s2  ;;  %v1121_v20 = vrot.slane %v804_v14, 9  ;;  %v820_v41 = vmul.f32 %v1120_v7, %v819_v18  ;;  %v828_v25 = vstv %s1114_s8  ;;  %s1488_s19 = sld [smem:[#allocation6 + $0xf]]  ;;  %s1491_s20 = sld [smem:[#allocation6 + $0x12]] }
 0x180   :  { %v822_v24 = vmul.f32 %v1120_v7, %v821_v40  ;;  %v1122_v26 = vrot.slane %v811_v16, 10  ;;  %v829_v27 = vmul.f32 %v1120_v7, %v828_v25  ;;  %v837_v44 = vstv %s1457_s7  ;;  %s1493_s21 = sld [smem:[#allocation6 + $0x14]]  ;;  %s1496_s22 = sld [smem:[#allocation6 + $0x13]] }
 0x181   :  { %v809_v39 = vadd.f32 %v1121_v20, %v802_v13  ;;  %v835_v30 = vstv %s1455_s9  ;;  %v839_v19 = vstv %s1459_s10  ;;  %v838_v43 = vmul.f32 %v1120_v7, %v837_v44  ;;  %s1501_s23 = sld [smem:[#allocation6 + $0x15]]  ;;  %s1503_s24 = sld [smem:[#allocation6 + $0x16]] }
 0x182   :  { %v1123_v29 = vrot.slane %v822_v24, 9  ;;  %v1124_v42 = vrot.slane %v829_v27, 10  ;;  %v840_v0 = vmul.f32 %v1120_v7, %v839_v19  ;;  %v846_v23 = vstv %s1461_s11  ;;  %s1521_s25 = sld [smem:[#allocation6 + $0x17]] }
 0x183   :  { %v816_v31 = vadd.f32 %v1122_v26, %v809_v39  ;;  %v847_v32 = vmul.f32 %v1120_v7, %v846_v23  ;;  %v933_v33 = vstv %s1468_s14  ;;  %v935_v21 = vstv %s1470_s15 }
 0x184   :  { %v827_v46 = vadd.f32 %v1123_v29, %v820_v41  ;;  %v1125_v34 = vrot.slane %v840_v0, 9  ;;  %v934_v35 = vmul.f32 %v1484_v28, %v933_v33  ;;  %v942_v36 = vstv %s1474_s3 }
 0x185   :  { %v818_v22 = vadd.f32 %v817_v17, %v816_v31  ;;  %v1126_v45 = vrot.slane %v847_v32, 10  ;;  %v936_v47 = vmul.f32 %v1484_v28, %v935_v21  ;;  %v853_v49 = vstv %s1476_s16 }
 0x186   :  { %v834_v38 = vadd.f32 %v1124_v42, %v827_v46  ;;  %v845_v48 = vadd.f32 %v1125_v34, %v838_v43  ;;  %v943_v50 = vmul.f32 %v1484_v28, %v942_v36  ;;  %v951_v51 = vstv %s1479_s17 }
 0x187   :  { %v859_v53 = vrot.slane %v818_v22, %v1466_v11  ;;  %v863_v54 = vrot.slane %v818_v22, %v1472_v37  ;;  %v1141_v55 = vrot.slane %v936_v47, 9  ;;  %v952_v2 = vmul.f32 %v1484_v28, %v951_v51 }
 0x188   :  { %v836_v52 = vadd.f32 %v835_v30, %v834_v38  ;;  %v852_v56 = vadd.f32 %v1126_v45, %v845_v48  ;;  %v1142_v57 = vrot.slane %v943_v50, 10  ;;  %v953_v58 = vstv %s1482_s18 }
 0x189   :  { %v941_v61 = vadd.f32 %v1141_v55, %v934_v35  ;;  %v954_v62 = vmul.f32 %v1484_v28, %v953_v58  ;;  %v949_v1 = vstv %s1488_s19  ;;  %v960_v3 = vstv %s1491_s20 }
 0x18a   :  { %v870_v59 = vrot.slane %v836_v52, %v1466_v11  ;;  %v874_v60 = vrot.slane %v836_v52, %v1472_v37  ;;  %v854_v63 = vadd.f32 %v853_v49, %v852_v56  ;;  %v969_v4 = vstv %s1493_s21 }
 0x18b   :  { %v948_v7 = vadd.f32 %v1142_v57, %v941_v61  ;;  %v1143_v8 = vrot.slane %v954_v62, 9  ;;  %v961_v12 = vmul.f32 %v1484_v28, %v960_v3  ;;  %v967_v13 = vstv %s1496_s22 }
 0x18c   :  { %v889_v5 = vsel %vm888_vm7, %v859_v53, %v870_v59  ;;  %v890_v6 = vsel %vm888_vm7, %v863_v54, %v874_v60  ;;  %v881_v9 = vrot.slane %v854_v63, %v1466_v11  ;;  %v885_v10 = vrot.slane %v854_v63, %v1472_v37 }
 0x18d   :  { %v959_v14 = vadd.f32 %v1143_v8, %v952_v2  ;;  %v970_v15 = vmul.f32 %v1484_v28, %v969_v4  ;;  %v971_v16 = vstv %s1501_s23  ;;  %v978_v17 = vstv %s1503_s24 }
 0x18e   :  { %v892_v18 = vsel %vm891_vm8, %v889_v5, %v881_v9  ;;  %v893_v40 = vsel %vm891_vm8, %v890_v6, %v885_v10  ;;  %v1144_v20 = vrot.slane %v961_v12, 10  ;;  %v972_v41 = vmul.f32 %v1484_v28, %v971_v16 }
 0x18f   :  { %v894_v24 = vadd.f32 1.0, %v892_v18  ;;  %v895_v25 = vadd.f32 1.0, %v893_v40  ;;  %v950_v26 = vadd.f32 %v949_v1, %v948_v7  ;;  %v979_v27 = vmul.f32 %v1484_v28, %v978_v17 }
 0x190   :  { %v966_v44 = vadd.f32 %v1144_v20, %v959_v14  ;;  %v1145_v39 = vrot.slane %v972_v41, 9  ;;  %v985_v23 = vstv %s1521_s25 }
 0x191   :  { %v896_v29 = vmul.f32 0.5, %v894_v24  ;;  %v897_v30 = vmul.f32 0.5, %v895_v25  ;;  %v1146_v19 = vrot.slane %v979_v27, 10  ;;  %v991_v31 = vrot.slane %v950_v26, %v1466_v11 }
 0x192   :  { %v968_v42 = vadd.f32 %v967_v13, %v966_v44  ;;  %v977_v43 = vadd.f32 %v1145_v39, %v970_v15  ;;  %v995_v46 = vrot.slane %v950_v26, %v1472_v37 }
 0x193   :  { %v900_v0 = vcombine.low %v896_v29, %v897_v30 }
 0x194   :  { %v984_v32 = vadd.f32 %v1146_v19, %v977_v43  ;;  %v1002_v33 = vrot.slane %v968_v42, %v1466_v11  ;;  %v1006_v34 = vrot.slane %v968_v42, %v1472_v37 }
 0x195   :  { %902 = vst [vmem:[%s1556_s5] sm:$0x77] %v900_v0 }
 0x196   :  { %v986_v28 = vadd.f32 %v985_v23, %v984_v32  ;;  %v1020_v35 = vsel %vm888_vm7, %v991_v31, %v1002_v33  ;;  %v1021_v21 = vsel %vm888_vm7, %v995_v46, %v1006_v34 }
 0x198   :  { %v1013_v36 = vrot.slane %v986_v28, %v1466_v11  ;;  %v1017_v22 = vrot.slane %v986_v28, %v1472_v37 }
 0x19a   :  { %v1022_v38 = vsel %vm891_vm8, %v1020_v35, %v1013_v36  ;;  %v1023_v45 = vsel %vm891_vm8, %v1021_v21, %v1017_v22 }
 0x19b   :  { %v1024_v47 = vadd.f32 1.0, %v1022_v38  ;;  %v1025_v48 = vadd.f32 1.0, %v1023_v45 }
 0x19d   :  { %v1026_v49 = vmul.f32 0.5, %v1024_v47  ;;  %v1027_v50 = vmul.f32 0.5, %v1025_v48 }
 0x19f   :  { %v1030_v51 = vcombine.low %v1026_v49, %v1027_v50 }
 0x1a1   :  { %1147 = vst [vmem:[%s1556_s5 + $0x8] sm:$0x77] %v1030_v51 }
 0x1a2 PF:  { %1037 = vsyncpa [#allocation3], 1 }
 0x1a3   :  { %1038 = vsyncpa [#allocation5], 1 }

</bundles_post_ra>
